<compile_context>
chip_gen: v5e
topology: v5e:2x2
jax: 0.10.0
libtpu: 0.0.40
codegen_flags: <defaults>
</compile_context>

<pallas_src>
import functools

import jax
import jax.numpy as jnp
import numpy as np
from jax.experimental import pallas as pl
from jax.experimental.pallas import tpu as pltpu


def _round_up(x, m):
    return ((x + m - 1) // m) * m


# ----------------------------------------------------------------------------
# Kernel 1: fused backbone level
#   feat  = relu(x @ w + b)                (1x1 conv on channels-last rows)
#   chsum = sum over spatial rows of feat  (per-batch, per-channel, for CAM mean)
# ----------------------------------------------------------------------------
def _backbone_kernel(x_ref, w_ref, b_ref, feat_ref, chsum_ref, *,
                     use_fma, valid_rows, tm):
    t = pl.program_id(1)
    x = x_ref[0]                                   # (tm, Cin)
    w = w_ref[...]                                 # (Cin, Cout)

    if use_fma:
        # Tiny contraction (Cin=3): broadcast VPU multiply-adds, skip the MXU.
        y = x[:, 0:1] * w[0:1, :]
        for c in range(1, w.shape[0]):
            y = y + x[:, c:c + 1] * w[c:c + 1, :]
    else:
        y = jnp.dot(x, w, preferred_element_type=jnp.float32)

    y = jnp.maximum(y + b_ref[...], 0.0)

    if valid_rows % tm != 0:
        # Zero padded rows so they neither pollute the channel sums nor the output.
        rows = t * tm + jax.lax.broadcasted_iota(jnp.int32, (tm, 1), 0)
        y = jnp.where(rows < valid_rows, y, 0.0)

    feat_ref[0] = y.astype(feat_ref.dtype)

    @pl.when(t == 0)
    def _():
        chsum_ref[...] = jnp.zeros_like(chsum_ref)

    chsum_ref[0] += jnp.sum(y, axis=0, keepdims=True)


def backbone_level(x_flat, w, b, *, max_tm=512):
    """Fused 1x1 conv + ReLU + per-channel spatial sum.

    x_flat: (B, M, Cin) channels-last rows.
    Returns feat (B, M, Cout) f32 and chsum (B, Cout) f32.
    """
    B, M, Cin = x_flat.shape
    Cout = w.shape[1]
    use_fma = Cin < 8                      # Cin=3 stem: VPU FMAs instead of K=3 MXU

    tm = min(max_tm, _round_up(M, 8))
    Mp = _round_up(M, tm)
    if Mp != M:
        x_flat = jnp.pad(x_flat, ((0, 0), (0, Mp - M), (0, 0)))
    n_tiles = Mp // tm

    feat, chsum = pl.pallas_call(
        functools.partial(_backbone_kernel, use_fma=use_fma, valid_rows=M, tm=tm),
        out_shape=(jax.ShapeDtypeStruct((B, Mp, Cout), jnp.float32),
                   jax.ShapeDtypeStruct((B, 1, Cout), jnp.float32)),
        grid=(B, n_tiles),
        in_specs=[
            pl.BlockSpec((1, tm, Cin), lambda bb, t: (bb, t, 0)),
            pl.BlockSpec((Cin, Cout), lambda bb, t: (0, 0)),
            pl.BlockSpec((1, Cout), lambda bb, t: (0, 0)),
        ],
        out_specs=(
            pl.BlockSpec((1, tm, Cout), lambda bb, t: (bb, t, 0)),
            pl.BlockSpec((1, 1, Cout), lambda bb, t: (bb, 0, 0)),   # resident accumulator
        ),
        compiler_params=pltpu.CompilerParams(
            dimension_semantics=("parallel", "arbitrary")),
    )(x_flat, w, b)

    if Mp != M:
        feat = feat[:, :M, :]
    return feat, chsum[:, 0, :]


# ----------------------------------------------------------------------------
# Kernel 2: fused RetinaNet head + CAM for one pyramid level.
# One lane-dense (tm, C) @ (C, 128) MXU matmul produces [cls | box | cam | pad].
# The CAM column of the per-batch weight holds the per-channel spatial mean, so
# cam = sum_c feat * mean exactly as in RetinaNet.forward.
# ----------------------------------------------------------------------------
def _head_kernel(feat_ref, w_ref, b_ref, out_ref):
    y = jnp.dot(feat_ref[0], w_ref[0], preferred_element_type=jnp.float32)
    out_ref[0] = (y + b_ref[...]).astype(out_ref.dtype)


def head_cam_level(feat_flat, chan_mean, cls_w, cls_b, box_w, box_b, *, max_tm=512):
    B, M, C = feat_flat.shape
    ncls, nbox = cls_w.shape[1], box_w.shape[1]
    cam_col = ncls + nbox
    n_out = _round_up(cam_col + 1, 128)            # pad packed output width to 128 lanes
    dt = feat_flat.dtype

    w_shared = (jnp.zeros((C, n_out), dt)
                .at[:, :ncls].set(cls_w)
                .at[:, ncls:cam_col].set(box_w))
    b_fused = (jnp.zeros((1, n_out), dt)
               .at[:, :ncls].set(cls_b)
               .at[:, ncls:cam_col].set(box_b))
    w_pb = jnp.broadcast_to(w_shared[None], (B, C, n_out))
    w_pb = w_pb.at[:, :, cam_col].set(chan_mean.astype(dt))    # per-batch CAM column

    tm = min(max_tm, _round_up(M, 8))
    Mp = _round_up(M, tm)
    if Mp != M:
        feat_flat = jnp.pad(feat_flat, ((0, 0), (0, Mp - M), (0, 0)))
    n_tiles = Mp // tm

    packed = pl.pallas_call(
        _head_kernel,
        out_shape=jax.ShapeDtypeStruct((B, Mp, n_out), dt),
        grid=(B, n_tiles),
        in_specs=[
            pl.BlockSpec((1, tm, C), lambda bb, t: (bb, t, 0)),
            pl.BlockSpec((1, C, n_out), lambda bb, t: (bb, 0, 0)),
            pl.BlockSpec((1, n_out), lambda bb, t: (0, 0)),
        ],
        out_specs=pl.BlockSpec((1, tm, n_out), lambda bb, t: (bb, t, 0)),
        compiler_params=pltpu.CompilerParams(
            dimension_semantics=("parallel", "parallel")),
    )(feat_flat, w_pb, b_fused)

    if Mp != M:
        packed = packed[:, :M, :]
    return packed, ncls, nbox


# ----------------------------------------------------------------------------
# Glue: channels-last 2x2 avg pool, params, full forward.
# ----------------------------------------------------------------------------
def downsample2_nhwc(x):
    B, H, W, C = x.shape
    return x.reshape(B, H // 2, 2, W // 2, 2, C).mean(axis=(2, 4))


def init_params(key, feat_ch=32, num_anchors=9, num_classes=4):
    ks = jax.random.split(key, 4)
    scale = 0.1
    return {
        "bb3_w": scale * jax.random.normal(ks[0], (3, feat_ch), jnp.float32),
        "bb3_b": jnp.zeros((1, feat_ch), jnp.float32),
        "bb4_w": scale * jax.random.normal(ks[1], (feat_ch, feat_ch), jnp.float32),
        "bb4_b": jnp.zeros((1, feat_ch), jnp.float32),
        "cls_w": scale * jax.random.normal(ks[2], (feat_ch, num_anchors * num_classes), jnp.float32),
        "cls_b": jnp.full((1, num_anchors * num_classes), -2.0, jnp.float32),  # prior-prob bias
        "box_w": scale * jax.random.normal(ks[3], (feat_ch, num_anchors * 4), jnp.float32),
        "box_b": jnp.zeros((1, num_anchors * 4), jnp.float32),
    }


def retinanet_forward(params, images_nchw):
    """Eval-mode forward.  images: (B, 3, H, W) NCHW (PyTorch convention).
    All feature maps / head outputs are channels-last (NHWC)."""
    x = jnp.transpose(images_nchw, (0, 2, 3, 1))           # single boundary conversion

    # --- backbone: two synthetic FPN levels (fused conv + ReLU + channel-sum) ---
    x3 = downsample2_nhwc(x)                                # (B, H/2, W/2, 3)
    B, H3, W3, _ = x3.shape
    feat3_flat, chsum3 = backbone_level(
        x3.reshape(B, H3 * W3, 3), params["bb3_w"], params["bb3_b"])

    x4 = downsample2_nhwc(feat3_flat.reshape(B, H3, W3, -1))
    _, H4, W4, C = x4.shape
    feat4_flat, chsum4 = backbone_level(
        x4.reshape(B, H4 * W4, C), params["bb4_w"], params["bb4_b"])

    features = [feat3_flat.reshape(B, H3, W3, -1),
                feat4_flat.reshape(B, H4, W4, -1)]

    # --- fused head: cls + bbox + CAM (mask_all) in one kernel per level ---
    mask_all, cls_logits, bbox_reg = [], [], []
    for feat_flat, chsum, (Hl, Wl) in ((feat3_flat, chsum3, (H3, W3)),
                                       (feat4_flat, chsum4, (H4, W4))):
        chan_mean = chsum / float(Hl * Wl)                  # (B, C) CAM channel mean
        packed, ncls, nbox = head_cam_level(
            feat_flat, chan_mean,
            params["cls_w"], params["cls_b"], params["box_w"], params["box_b"])
        cls_logits.append(packed[..., :ncls].reshape(B, Hl, Wl, ncls))
        bbox_reg.append(packed[..., ncls:ncls + nbox].reshape(B, Hl, Wl, nbox))
        mask_all.append(packed[..., ncls + nbox].reshape(B, Hl, Wl))

    # TODO(synk): anchor generation + box selection (detections/NMS) not reproduced.
    detections = (cls_logits, bbox_reg)
    return features, mask_all, detections


# ----------------------------------------------------------------------------
# Self-test
# ----------------------------------------------------------------------------
def _np_pool(x):
    B, H, W, C = x.shape
    return x.reshape(B, H // 2, 2, W // 2, 2, C).mean(axis=(2, 4))


if __name__ == "__main__":
    key = jax.random.PRNGKey(0)
    k_img, k_par = jax.random.split(key)

    images = jax.random.normal(k_img, (2, 3, 32, 32), jnp.float32)   # NCHW input
    params = init_params(k_par)

    fwd = jax.jit(retinanet_forward)
    features, mask_all, (cls_logits, bbox_reg) = fwd(params, images)
    jax.block_until_ready((features, mask_all, cls_logits, bbox_reg))

    # ---- float64 references (PyTorch semantics) ----------------------------
    p64 = {k: np.asarray(v, np.float64) for k, v in params.items()}
    img = np.asarray(images, np.float64).transpose(0, 2, 3, 1)       # NHWC

    x3 = _np_pool(img)
    f3 = np.maximum(x3 @ p64["bb3_w"] + p64["bb3_b"], 0.0)
    x4 = _np_pool(f3)
    f4 = np.maximum(x4 @ p64["bb4_w"] + p64["bb4_b"], 0.0)
    ref_feats = [f3, f4]

    ok = True
    for f_pl, f_ref in zip(features, ref_feats):
        ok &= np.allclose(np.asarray(f_pl), f_ref, rtol=1e-3, atol=5e-4)

    for f_pl, cam_pl, cls_pl, box_pl in zip(features, mask_all, cls_logits, bbox_reg):
        f = np.asarray(f_pl, np.float64)
        Bn, Hl, Wl, C = f.shape
        mean = f.reshape(Bn, Hl * Wl, C).mean(axis=1)                 # (B, C)
        ref_cam = (f * mean[:, None, None, :]).sum(axis=-1)           # CAM semantics
        ref_cls = f @ p64["cls_w"] + p64["cls_b"]
        ref_box = f @ p64["box_w"] + p64["box_b"]
        ok &= np.allclose(np.asarray(cam_pl), ref_cam, rtol=1e-3, atol=5e-4)
        ok &= np.allclose(np.asarray(cls_pl), ref_cls, rtol=1e-3, atol=5e-4)
        ok &= np.allclose(np.asarray(box_pl), ref_box, rtol=1e-3, atol=5e-4)

    # shape sanity (channels-last)
    assert features[0].shape == (2, 16, 16, 32)
    assert features[1].shape == (2, 8, 8, 32)
    assert mask_all[0].shape == (2, 16, 16)
    assert mask_all[1].shape == (2, 8, 8)
    assert cls_logits[0].shape == (2, 16, 16, 36)
    assert bbox_reg[1].shape == (2, 8, 8, 36)

    if not ok:
        raise SystemExit("Pallas RetinaNet outputs mismatch reference")
    print("KERNEL_OK")
</pallas_src>

<mosaic_0001>
module attributes {stable_mosaic.version = 11 : i64} {
  func.func @_backbone_kernel(%arg0: i32, %arg1: i32, %arg2: memref<1x256x3xf32, #tpu.memory_space<vmem>>, %arg3: memref<3x32xf32, #tpu.memory_space<vmem>>, %arg4: memref<1x32xf32, #tpu.memory_space<vmem>>, %arg5: memref<1x256x32xf32, #tpu.memory_space<vmem>>, %arg6: memref<1x1x32xf32, #tpu.memory_space<vmem>>) attributes {dimension_semantics = [#tpu.dimension_semantics<parallel>, #tpu.dimension_semantics<arbitrary>], iteration_bounds = array<i64: 2, 1>, scalar_prefetch = 0 : i64, scratch_operands = 0 : i64, tpu.core_type = #tpu.core_type<tc>, window_params = [{transform_indices = @transform_0, window_bounds = array<i64: 1, 256, 3>}, {pipeline_mode = #tpu.pipeline_mode<synchronous>, transform_indices = @transform_1, window_bounds = array<i64: 3, 32>}, {pipeline_mode = #tpu.pipeline_mode<synchronous>, transform_indices = @transform_2, window_bounds = array<i64: 1, 32>}, {transform_indices = @transform_3, window_bounds = array<i64: 1, 256, 32>}, {transform_indices = @transform_4, window_bounds = array<i64: 1, 1, 32>}]} {
    %c0 = arith.constant 0 : index
    %c0_0 = arith.constant 0 : index
    %c0_1 = arith.constant 0 : index
    %0 = vector.load %arg2[%c0, %c0_0, %c0_1] : memref<1x256x3xf32, #tpu.memory_space<vmem>>, vector<1x256x3xf32>
    %1 = vector.shape_cast %0 : vector<1x256x3xf32> to vector<256x3xf32>
    %c0_2 = arith.constant 0 : index
    %c0_3 = arith.constant 0 : index
    %2 = vector.load %arg3[%c0_2, %c0_3] : memref<3x32xf32, #tpu.memory_space<vmem>>, vector<3x32xf32>
    %3 = vector.extract_strided_slice %1 {offsets = [0, 0], sizes = [256, 1], strides = [1, 1]} : vector<256x3xf32> to vector<256x1xf32>
    %4 = vector.extract_strided_slice %2 {offsets = [0, 0], sizes = [1, 32], strides = [1, 1]} : vector<3x32xf32> to vector<1x32xf32>
    %5 = vector.broadcast %3 : vector<256x1xf32> to vector<256x32xf32>
    %6 = vector.broadcast %4 : vector<1x32xf32> to vector<256x32xf32>
    %7 = arith.mulf %5, %6 : vector<256x32xf32>
    %8 = vector.extract_strided_slice %1 {offsets = [0, 1], sizes = [256, 1], strides = [1, 1]} : vector<256x3xf32> to vector<256x1xf32>
    %9 = vector.extract_strided_slice %2 {offsets = [1, 0], sizes = [1, 32], strides = [1, 1]} : vector<3x32xf32> to vector<1x32xf32>
    %10 = vector.broadcast %8 : vector<256x1xf32> to vector<256x32xf32>
    %11 = vector.broadcast %9 : vector<1x32xf32> to vector<256x32xf32>
    %12 = arith.mulf %10, %11 : vector<256x32xf32>
    %13 = arith.addf %7, %12 : vector<256x32xf32>
    %14 = vector.extract_strided_slice %1 {offsets = [0, 2], sizes = [256, 1], strides = [1, 1]} : vector<256x3xf32> to vector<256x1xf32>
    %15 = vector.extract_strided_slice %2 {offsets = [2, 0], sizes = [1, 32], strides = [1, 1]} : vector<3x32xf32> to vector<1x32xf32>
    %16 = vector.broadcast %14 : vector<256x1xf32> to vector<256x32xf32>
    %17 = vector.broadcast %15 : vector<1x32xf32> to vector<256x32xf32>
    %18 = arith.mulf %16, %17 : vector<256x32xf32>
    %19 = arith.addf %13, %18 : vector<256x32xf32>
    %c0_4 = arith.constant 0 : index
    %c0_5 = arith.constant 0 : index
    %20 = vector.load %arg4[%c0_4, %c0_5] : memref<1x32xf32, #tpu.memory_space<vmem>>, vector<1x32xf32>
    %21 = vector.broadcast %20 : vector<1x32xf32> to vector<256x32xf32>
    %22 = arith.addf %19, %21 : vector<256x32xf32>
    %cst = arith.constant 0.000000e+00 : f32
    %23 = vector.broadcast %cst : f32 to vector<256x32xf32>
    %24 = arith.maximumf %22, %23 : vector<256x32xf32>
    %c0_6 = arith.constant 0 : index
    %c0_7 = arith.constant 0 : index
    %c0_8 = arith.constant 0 : index
    %25 = vector.load %arg5[%c0_6, %c0_7, %c0_8] : memref<1x256x32xf32, #tpu.memory_space<vmem>>, vector<1x256x32xf32>
    %26 = vector.shape_cast %25 : vector<1x256x32xf32> to vector<256x32xf32>
    %27 = vector.shape_cast %24 : vector<256x32xf32> to vector<1x256x32xf32>
    tpu.vector_store %arg5[%c0_6, %c0_7, %c0_8], %27 {strides = array<i32>} : memref<1x256x32xf32, #tpu.memory_space<vmem>>, vector<1x256x32xf32>,
    %c0_i32 = arith.constant 0 : i32
    %28 = arith.cmpi eq, %arg1, %c0_i32 : i32
    %29 = arith.extui %28 : i1 to i32
    %c0_i32_9 = arith.constant 0 : i32
    %30 = arith.cmpi ne, %29, %c0_i32_9 : i32
    scf.if %30 {
      %cst_17 = arith.constant 0.000000e+00 : f32
      %39 = vector.broadcast %cst_17 : f32 to vector<1x1x32xf32>
      %c0_18 = arith.constant 0 : index
      %c0_19 = arith.constant 0 : index
      %c0_20 = arith.constant 0 : index
      %40 = vector.load %arg6[%c0_18, %c0_19, %c0_20] : memref<1x1x32xf32, #tpu.memory_space<vmem>>, vector<1x1x32xf32>
      tpu.vector_store %arg6[%c0_18, %c0_19, %c0_20], %39 {strides = array<i32>} : memref<1x1x32xf32, #tpu.memory_space<vmem>>, vector<1x1x32xf32>,
    } else {
    }
    %c0_10 = arith.constant 0 : index
    %c0_11 = arith.constant 0 : index
    %c0_12 = arith.constant 0 : index
    %31 = vector.load %arg6[%c0_10, %c0_11, %c0_12] : memref<1x1x32xf32, #tpu.memory_space<vmem>>, vector<1x1x32xf32>
    %32 = vector.shape_cast %31 : vector<1x1x32xf32> to vector<1x32xf32>
    %cst_13 = arith.constant dense<0.000000e+00> : vector<32xf32>
    %33 = vector.multi_reduction <add>, %24, %cst_13 [0] : vector<256x32xf32> to vector<32xf32>
    %34 = vector.shape_cast %33 : vector<32xf32> to vector<1x32xf32>
    %35 = arith.addf %32, %34 : vector<1x32xf32>
    %c0_14 = arith.constant 0 : index
    %c0_15 = arith.constant 0 : index
    %c0_16 = arith.constant 0 : index
    %36 = vector.load %arg6[%c0_14, %c0_15, %c0_16] : memref<1x1x32xf32, #tpu.memory_space<vmem>>, vector<1x1x32xf32>
    %37 = vector.shape_cast %36 : vector<1x1x32xf32> to vector<1x32xf32>
    %38 = vector.shape_cast %35 : vector<1x32xf32> to vector<1x1x32xf32>
    tpu.vector_store %arg6[%c0_14, %c0_15, %c0_16], %38 {strides = array<i32>} : memref<1x1x32xf32, #tpu.memory_space<vmem>>, vector<1x1x32xf32>,
    return
  }
  func.func @transform_0(%arg0: i32, %arg1: i32) -> (i32, i32, i32) {
    %c0_i32 = arith.constant 0 : i32
    %c0_i32_0 = arith.constant 0 : i32
    return %arg0, %arg1, %c0_i32 : i32, i32, i32
  }
  func.func @transform_1(%arg0: i32, %arg1: i32) -> (i32, i32) {
    %c0_i32 = arith.constant 0 : i32
    %c0_i32_0 = arith.constant 0 : i32
    %c0_i32_1 = arith.constant 0 : i32
    return %c0_i32, %c0_i32_0 : i32, i32
  }
  func.func @transform_2(%arg0: i32, %arg1: i32) -> (i32, i32) {
    %c0_i32 = arith.constant 0 : i32
    %c0_i32_0 = arith.constant 0 : i32
    %c0_i32_1 = arith.constant 0 : i32
    return %c0_i32, %c0_i32_0 : i32, i32
  }
  func.func @transform_3(%arg0: i32, %arg1: i32) -> (i32, i32, i32) {
    %c0_i32 = arith.constant 0 : i32
    %c0_i32_0 = arith.constant 0 : i32
    return %arg0, %arg1, %c0_i32 : i32, i32, i32
  }
  func.func @transform_4(%arg0: i32, %arg1: i32) -> (i32, i32, i32) {
    %c0_i32 = arith.constant 0 : i32
    %c0_i32_0 = arith.constant 0 : i32
    %c0_i32_1 = arith.constant 0 : i32
    return %arg0, %c0_i32, %c0_i32_0 : i32, i32, i32
  }
}

module attributes {stable_mosaic.version = 11 : i64} {
  func.func @_backbone_kernel(%arg0: i32, %arg1: i32, %arg2: memref<1x64x32xf32, #tpu.memory_space<vmem>>, %arg3: memref<32x32xf32, #tpu.memory_space<vmem>>, %arg4: memref<1x32xf32, #tpu.memory_space<vmem>>, %arg5: memref<1x64x32xf32, #tpu.memory_space<vmem>>, %arg6: memref<1x1x32xf32, #tpu.memory_space<vmem>>) attributes {dimension_semantics = [#tpu.dimension_semantics<parallel>, #tpu.dimension_semantics<arbitrary>], iteration_bounds = array<i64: 2, 1>, scalar_prefetch = 0 : i64, scratch_operands = 0 : i64, tpu.core_type = #tpu.core_type<tc>, window_params = [{transform_indices = @transform_0, window_bounds = array<i64: 1, 64, 32>}, {pipeline_mode = #tpu.pipeline_mode<synchronous>, transform_indices = @transform_1, window_bounds = array<i64: 32, 32>}, {pipeline_mode = #tpu.pipeline_mode<synchronous>, transform_indices = @transform_2, window_bounds = array<i64: 1, 32>}, {transform_indices = @transform_3, window_bounds = array<i64: 1, 64, 32>}, {transform_indices = @transform_4, window_bounds = array<i64: 1, 1, 32>}]} {
    %c0 = arith.constant 0 : index
    %c0_0 = arith.constant 0 : index
    %c0_1 = arith.constant 0 : index
    %0 = vector.load %arg2[%c0, %c0_0, %c0_1] : memref<1x64x32xf32, #tpu.memory_space<vmem>>, vector<1x64x32xf32>
    %1 = vector.shape_cast %0 : vector<1x64x32xf32> to vector<64x32xf32>
    %c0_2 = arith.constant 0 : index
    %c0_3 = arith.constant 0 : index
    %2 = vector.load %arg3[%c0_2, %c0_3] : memref<32x32xf32, #tpu.memory_space<vmem>>, vector<32x32xf32>
    %cst = arith.constant dense<0.000000e+00> : vector<64x32xf32>
    %3 = tpu.matmul %1, %2, %cst {dimension_numbers = #tpu.dot_dimension_numbers<[1], [0], [0], [1], [0, 0, 1, 1], [], []>} : vector<64x32xf32>, vector<32x32xf32>, vector<64x32xf32> -> vector<64x32xf32>
    %c0_4 = arith.constant 0 : index
    %c0_5 = arith.constant 0 : index
    %4 = vector.load %arg4[%c0_4, %c0_5] : memref<1x32xf32, #tpu.memory_space<vmem>>, vector<1x32xf32>
    %5 = vector.broadcast %4 : vector<1x32xf32> to vector<64x32xf32>
    %6 = arith.addf %3, %5 : vector<64x32xf32>
    %cst_6 = arith.constant 0.000000e+00 : f32
    %7 = vector.broadcast %cst_6 : f32 to vector<64x32xf32>
    %8 = arith.maximumf %6, %7 : vector<64x32xf32>
    %c0_7 = arith.constant 0 : index
    %c0_8 = arith.constant 0 : index
    %c0_9 = arith.constant 0 : index
    %9 = vector.load %arg5[%c0_7, %c0_8, %c0_9] : memref<1x64x32xf32, #tpu.memory_space<vmem>>, vector<1x64x32xf32>
    %10 = vector.shape_cast %9 : vector<1x64x32xf32> to vector<64x32xf32>
    %11 = vector.shape_cast %8 : vector<64x32xf32> to vector<1x64x32xf32>
    tpu.vector_store %arg5[%c0_7, %c0_8, %c0_9], %11 {strides = array<i32>} : memref<1x64x32xf32, #tpu.memory_space<vmem>>, vector<1x64x32xf32>,
    %c0_i32 = arith.constant 0 : i32
    %12 = arith.cmpi eq, %arg1, %c0_i32 : i32
    %13 = arith.extui %12 : i1 to i32
    %c0_i32_10 = arith.constant 0 : i32
    %14 = arith.cmpi ne, %13, %c0_i32_10 : i32
    scf.if %14 {
      %cst_18 = arith.constant 0.000000e+00 : f32
      %23 = vector.broadcast %cst_18 : f32 to vector<1x1x32xf32>
      %c0_19 = arith.constant 0 : index
      %c0_20 = arith.constant 0 : index
      %c0_21 = arith.constant 0 : index
      %24 = vector.load %arg6[%c0_19, %c0_20, %c0_21] : memref<1x1x32xf32, #tpu.memory_space<vmem>>, vector<1x1x32xf32>
      tpu.vector_store %arg6[%c0_19, %c0_20, %c0_21], %23 {strides = array<i32>} : memref<1x1x32xf32, #tpu.memory_space<vmem>>, vector<1x1x32xf32>,
    } else {
    }
    %c0_11 = arith.constant 0 : index
    %c0_12 = arith.constant 0 : index
    %c0_13 = arith.constant 0 : index
    %15 = vector.load %arg6[%c0_11, %c0_12, %c0_13] : memref<1x1x32xf32, #tpu.memory_space<vmem>>, vector<1x1x32xf32>
    %16 = vector.shape_cast %15 : vector<1x1x32xf32> to vector<1x32xf32>
    %cst_14 = arith.constant dense<0.000000e+00> : vector<32xf32>
    %17 = vector.multi_reduction <add>, %8, %cst_14 [0] : vector<64x32xf32> to vector<32xf32>
    %18 = vector.shape_cast %17 : vector<32xf32> to vector<1x32xf32>
    %19 = arith.addf %16, %18 : vector<1x32xf32>
    %c0_15 = arith.constant 0 : index
    %c0_16 = arith.constant 0 : index
    %c0_17 = arith.constant 0 : index
    %20 = vector.load %arg6[%c0_15, %c0_16, %c0_17] : memref<1x1x32xf32, #tpu.memory_space<vmem>>, vector<1x1x32xf32>
    %21 = vector.shape_cast %20 : vector<1x1x32xf32> to vector<1x32xf32>
    %22 = vector.shape_cast %19 : vector<1x32xf32> to vector<1x1x32xf32>
    tpu.vector_store %arg6[%c0_15, %c0_16, %c0_17], %22 {strides = array<i32>} : memref<1x1x32xf32, #tpu.memory_space<vmem>>, vector<1x1x32xf32>,
    return
  }
  func.func @transform_0(%arg0: i32, %arg1: i32) -> (i32, i32, i32) {
    %c0_i32 = arith.constant 0 : i32
    %c0_i32_0 = arith.constant 0 : i32
    return %arg0, %arg1, %c0_i32 : i32, i32, i32
  }
  func.func @transform_1(%arg0: i32, %arg1: i32) -> (i32, i32) {
    %c0_i32 = arith.constant 0 : i32
    %c0_i32_0 = arith.constant 0 : i32
    %c0_i32_1 = arith.constant 0 : i32
    return %c0_i32, %c0_i32_0 : i32, i32
  }
  func.func @transform_2(%arg0: i32, %arg1: i32) -> (i32, i32) {
    %c0_i32 = arith.constant 0 : i32
    %c0_i32_0 = arith.constant 0 : i32
    %c0_i32_1 = arith.constant 0 : i32
    return %c0_i32, %c0_i32_0 : i32, i32
  }
  func.func @transform_3(%arg0: i32, %arg1: i32) -> (i32, i32, i32) {
    %c0_i32 = arith.constant 0 : i32
    %c0_i32_0 = arith.constant 0 : i32
    return %arg0, %arg1, %c0_i32 : i32, i32, i32
  }
  func.func @transform_4(%arg0: i32, %arg1: i32) -> (i32, i32, i32) {
    %c0_i32 = arith.constant 0 : i32
    %c0_i32_0 = arith.constant 0 : i32
    %c0_i32_1 = arith.constant 0 : i32
    return %arg0, %c0_i32, %c0_i32_0 : i32, i32, i32
  }
}

module attributes {stable_mosaic.version = 11 : i64} {
  func.func @_head_kernel(%arg0: i32, %arg1: i32, %arg2: memref<1x64x32xf32, #tpu.memory_space<vmem>>, %arg3: memref<1x32x128xf32, #tpu.memory_space<vmem>>, %arg4: memref<1x128xf32, #tpu.memory_space<vmem>>, %arg5: memref<1x64x128xf32, #tpu.memory_space<vmem>>) attributes {dimension_semantics = [#tpu.dimension_semantics<parallel>, #tpu.dimension_semantics<parallel>], iteration_bounds = array<i64: 2, 1>, scalar_prefetch = 0 : i64, scratch_operands = 0 : i64, tpu.core_type = #tpu.core_type<tc>, window_params = [{transform_indices = @transform_0, window_bounds = array<i64: 1, 64, 32>}, {transform_indices = @transform_1, window_bounds = array<i64: 1, 32, 128>}, {pipeline_mode = #tpu.pipeline_mode<synchronous>, transform_indices = @transform_2, window_bounds = array<i64: 1, 128>}, {transform_indices = @transform_3, window_bounds = array<i64: 1, 64, 128>}]} {
    %c0 = arith.constant 0 : index
    %c0_0 = arith.constant 0 : index
    %c0_1 = arith.constant 0 : index
    %0 = vector.load %arg2[%c0, %c0_0, %c0_1] : memref<1x64x32xf32, #tpu.memory_space<vmem>>, vector<1x64x32xf32>
    %1 = vector.shape_cast %0 : vector<1x64x32xf32> to vector<64x32xf32>
    %c0_2 = arith.constant 0 : index
    %c0_3 = arith.constant 0 : index
    %c0_4 = arith.constant 0 : index
    %2 = vector.load %arg3[%c0_2, %c0_3, %c0_4] : memref<1x32x128xf32, #tpu.memory_space<vmem>>, vector<1x32x128xf32>
    %3 = vector.shape_cast %2 : vector<1x32x128xf32> to vector<32x128xf32>
    %cst = arith.constant dense<0.000000e+00> : vector<64x128xf32>
    %4 = tpu.matmul %1, %3, %cst {dimension_numbers = #tpu.dot_dimension_numbers<[1], [0], [0], [1], [0, 0, 1, 1], [], []>} : vector<64x32xf32>, vector<32x128xf32>, vector<64x128xf32> -> vector<64x128xf32>
    %c0_5 = arith.constant 0 : index
    %c0_6 = arith.constant 0 : index
    %5 = vector.load %arg4[%c0_5, %c0_6] : memref<1x128xf32, #tpu.memory_space<vmem>>, vector<1x128xf32>
    %6 = vector.broadcast %5 : vector<1x128xf32> to vector<64x128xf32>
    %7 = arith.addf %4, %6 : vector<64x128xf32>
    %c0_7 = arith.constant 0 : index
    %c0_8 = arith.constant 0 : index
    %c0_9 = arith.constant 0 : index
    %8 = vector.load %arg5[%c0_7, %c0_8, %c0_9] : memref<1x64x128xf32, #tpu.memory_space<vmem>>, vector<1x64x128xf32>
    %9 = vector.shape_cast %8 : vector<1x64x128xf32> to vector<64x128xf32>
    %10 = vector.shape_cast %7 : vector<64x128xf32> to vector<1x64x128xf32>
    tpu.vector_store %arg5[%c0_7, %c0_8, %c0_9], %10 {strides = array<i32>} : memref<1x64x128xf32, #tpu.memory_space<vmem>>, vector<1x64x128xf32>,
    return
  }
  func.func @transform_0(%arg0: i32, %arg1: i32) -> (i32, i32, i32) {
    %c0_i32 = arith.constant 0 : i32
    %c0_i32_0 = arith.constant 0 : i32
    return %arg0, %arg1, %c0_i32 : i32, i32, i32
  }
  func.func @transform_1(%arg0: i32, %arg1: i32) -> (i32, i32, i32) {
    %c0_i32 = arith.constant 0 : i32
    %c0_i32_0 = arith.constant 0 : i32
    %c0_i32_1 = arith.constant 0 : i32
    return %arg0, %c0_i32, %c0_i32_0 : i32, i32, i32
  }
  func.func @transform_2(%arg0: i32, %arg1: i32) -> (i32, i32) {
    %c0_i32 = arith.constant 0 : i32
    %c0_i32_0 = arith.constant 0 : i32
    %c0_i32_1 = arith.constant 0 : i32
    return %c0_i32, %c0_i32_0 : i32, i32
  }
  func.func @transform_3(%arg0: i32, %arg1: i32) -> (i32, i32, i32) {
    %c0_i32 = arith.constant 0 : i32
    %c0_i32_0 = arith.constant 0 : i32
    return %arg0, %arg1, %c0_i32 : i32, i32, i32
  }
}

module attributes {stable_mosaic.version = 11 : i64} {
  func.func @_head_kernel(%arg0: i32, %arg1: i32, %arg2: memref<1x256x32xf32, #tpu.memory_space<vmem>>, %arg3: memref<1x32x128xf32, #tpu.memory_space<vmem>>, %arg4: memref<1x128xf32, #tpu.memory_space<vmem>>, %arg5: memref<1x256x128xf32, #tpu.memory_space<vmem>>) attributes {dimension_semantics = [#tpu.dimension_semantics<parallel>, #tpu.dimension_semantics<parallel>], iteration_bounds = array<i64: 2, 1>, scalar_prefetch = 0 : i64, scratch_operands = 0 : i64, tpu.core_type = #tpu.core_type<tc>, window_params = [{transform_indices = @transform_0, window_bounds = array<i64: 1, 256, 32>}, {transform_indices = @transform_1, window_bounds = array<i64: 1, 32, 128>}, {pipeline_mode = #tpu.pipeline_mode<synchronous>, transform_indices = @transform_2, window_bounds = array<i64: 1, 128>}, {transform_indices = @transform_3, window_bounds = array<i64: 1, 256, 128>}]} {
    %c0 = arith.constant 0 : index
    %c0_0 = arith.constant 0 : index
    %c0_1 = arith.constant 0 : index
    %0 = vector.load %arg2[%c0, %c0_0, %c0_1] : memref<1x256x32xf32, #tpu.memory_space<vmem>>, vector<1x256x32xf32>
    %1 = vector.shape_cast %0 : vector<1x256x32xf32> to vector<256x32xf32>
    %c0_2 = arith.constant 0 : index
    %c0_3 = arith.constant 0 : index
    %c0_4 = arith.constant 0 : index
    %2 = vector.load %arg3[%c0_2, %c0_3, %c0_4] : memref<1x32x128xf32, #tpu.memory_space<vmem>>, vector<1x32x128xf32>
    %3 = vector.shape_cast %2 : vector<1x32x128xf32> to vector<32x128xf32>
    %cst = arith.constant dense<0.000000e+00> : vector<256x128xf32>
    %4 = tpu.matmul %1, %3, %cst {dimension_numbers = #tpu.dot_dimension_numbers<[1], [0], [0], [1], [0, 0, 1, 1], [], []>} : vector<256x32xf32>, vector<32x128xf32>, vector<256x128xf32> -> vector<256x128xf32>
    %c0_5 = arith.constant 0 : index
    %c0_6 = arith.constant 0 : index
    %5 = vector.load %arg4[%c0_5, %c0_6] : memref<1x128xf32, #tpu.memory_space<vmem>>, vector<1x128xf32>
    %6 = vector.broadcast %5 : vector<1x128xf32> to vector<256x128xf32>
    %7 = arith.addf %4, %6 : vector<256x128xf32>
    %c0_7 = arith.constant 0 : index
    %c0_8 = arith.constant 0 : index
    %c0_9 = arith.constant 0 : index
    %8 = vector.load %arg5[%c0_7, %c0_8, %c0_9] : memref<1x256x128xf32, #tpu.memory_space<vmem>>, vector<1x256x128xf32>
    %9 = vector.shape_cast %8 : vector<1x256x128xf32> to vector<256x128xf32>
    %10 = vector.shape_cast %7 : vector<256x128xf32> to vector<1x256x128xf32>
    tpu.vector_store %arg5[%c0_7, %c0_8, %c0_9], %10 {strides = array<i32>} : memref<1x256x128xf32, #tpu.memory_space<vmem>>, vector<1x256x128xf32>,
    return
  }
  func.func @transform_0(%arg0: i32, %arg1: i32) -> (i32, i32, i32) {
    %c0_i32 = arith.constant 0 : i32
    %c0_i32_0 = arith.constant 0 : i32
    return %arg0, %arg1, %c0_i32 : i32, i32, i32
  }
  func.func @transform_1(%arg0: i32, %arg1: i32) -> (i32, i32, i32) {
    %c0_i32 = arith.constant 0 : i32
    %c0_i32_0 = arith.constant 0 : i32
    %c0_i32_1 = arith.constant 0 : i32
    return %arg0, %c0_i32, %c0_i32_0 : i32, i32, i32
  }
  func.func @transform_2(%arg0: i32, %arg1: i32) -> (i32, i32) {
    %c0_i32 = arith.constant 0 : i32
    %c0_i32_0 = arith.constant 0 : i32
    %c0_i32_1 = arith.constant 0 : i32
    return %c0_i32, %c0_i32_0 : i32, i32
  }
  func.func @transform_3(%arg0: i32, %arg1: i32) -> (i32, i32, i32) {
    %c0_i32 = arith.constant 0 : i32
    %c0_i32_0 = arith.constant 0 : i32
    return %arg0, %arg1, %c0_i32 : i32, i32, i32
  }
}

</mosaic_0001>

<bundles_post_ra>
// kernel: retinanet_forward.4
= control target key start
LH: loop header
LB: loop body
LE: loop exit
PB: predicated region body
PF: predicated region fallthrough
CT: control target
= control target key end

     0   :  { %s1254_s15 = smov 0   ;;  %s1256_s16 = smov 0   ;;  %s1989_s0 = inlined_call_operand.vmem [shape: f32[2,256,3], index: 0, kind: input, shape index: {}]   ;;  %s1990_s1 = inlined_call_operand.vmem [shape: f32[3,32], index: 1, kind: input, shape index: {}]   ;;  %s1991_s2 = inlined_call_operand.vmem [shape: f32[1,32], index: 2, kind: input, shape index: {}]   ;;  %s1992_s3 = inlined_call_operand.vmem [shape: f32[2,256,32], index: 3, kind: output, shape index: {0}]   ;;  %s1993_s4 = inlined_call_operand.vmem [shape: f32[2,1,32], index: 4, kind: output, shape index: {1}]  }
   0x1   :  { %s1258_s17 = smov 0  }
   0x2 LB: > { %s27_s18 = sadd.s32 1, %s1219_s16  ;;  %p1154_p0 = scmp.ge.s32.totalorder %s1223_s17, 1  ;;  %s1223_s17 = sphi %s1258_s17, %s15_s17   ;;  %s1219_s16 = sphi %s1256_s16, %s2007_s16   ;;  %s1215_s15 = sphi %s1254_s15, %s2006_s15  }
   0x3   : > { %p29_p1 = scmp.ge.s32.totalorder %s27_s18, 2  ;;  %p186_p2 = scmp.lt.s32.totalorder %s1223_s17, 3 }
   0x5   : > { %s2009_s18 = smov (%p29_p1, %s27_s18), 0  ;;  %p187_p3 = pnand %p1154_p0, %p186_p2 }
   0x7   : > { %190 = sbr.rel (%p187_p3) target bundleno = 417 (0x1a1), region = 32 }
   0xc   : > { %p224_p4 = scmp.lt.s32.totalorder %s1215_s15, 1  ;;  %v1225_v0 = vmov 0   ;;  %v1226_v33 = vmov 1   ;;  %v1488_v58 = vld [vmem:[%s1990_s1] sm:$0x7]  ;;  %v1227_v61 = vmov 2  }
   0xd   : > { %1193 = vset.pattern.permute.xlu2 %v1225_v0  ;;  %1192 = vset.pattern.permute.xlu1 %v1225_v0  ;;  %1998 = vst [vmem:[#allocation4_spill] sm:$0xff] %v1488_v58  ;;  %v1491_v59 = vperm.slane %v1488_v58, 1  ;;  %v1495_v60 = vperm.slane %v1488_v58, 0  ;;  %vm926_vm0 = vcmask 261120   ;;  %vm963_vm1 = vcmask 253952  }
   0xe   : > { %1191 = vset.pattern.permute.xlu0 %v1225_v0  ;;  %s2011_s15 = smov (!%p224_p4, %s1215_s15), 1 }
   0xf   : > { %s1161_s19 = sshll.u32 %s2011_s15, 8  ;;  %s1909_s6 = scalar_lea.vmem %s1993_s4, %s2011_s15 }
  0x10   : > { %s1280_s22 = scalar_lea.vmem %s1989_s0, %s1161_s19  ;;  %s1694_s29 = scalar_lea.vmem %s1992_s3, %s1161_s19 }
  0x11   : > { %v1283_v1 = vld [vmem:[%s1280_s22 + $0x20] sm:$0xff]  ;;  %v1286_v2 = vld [vmem:[%s1280_s22 + $0x10] sm:$0xff]  ;;  %v1295_v4 = vld [vmem:[%s1280_s22 + $0x28] sm:$0xff] }
  0x12   : > { %v1289_v3 = vld [vmem:[%s1280_s22] sm:$0xff]  ;;  %301 = vperm.xlu2 %1193, %v1283_v1   ;;  %291 = vperm.xlu1 %1192, %v1286_v2   ;;  %v1298_v5 = vld [vmem:[%s1280_s22 + $0x18] sm:$0xff]  ;;  %v1301_v6 = vld [vmem:[%s1280_s22 + $0x8] sm:$0xff] }
  0x13   : > { %281 = vperm.xlu0 %1191, %v1289_v3   ;;  %v1307_v7 = vld [vmem:[%s1280_s22 + $0x40] sm:$0xff]  ;;  %v1310_v8 = vld [vmem:[%s1280_s22 + $0x38] sm:$0xff]  ;;  %v1313_v9 = vld [vmem:[%s1280_s22 + $0x30] sm:$0xff] }
  0x14   : > { %v1319_v10 = vld [vmem:[%s1280_s22 + $0x58] sm:$0xff]  ;;  %v1322_v11 = vld [vmem:[%s1280_s22 + $0x50] sm:$0xff]  ;;  %v1325_v12 = vld [vmem:[%s1280_s22 + $0x48] sm:$0xff] }
  0x15   : > { %v1331_v13 = vld [vmem:[%s1280_s22 + $0x70] sm:$0xff]  ;;  %v1334_v14 = vld [vmem:[%s1280_s22 + $0x68] sm:$0xff]  ;;  %v1337_v15 = vld [vmem:[%s1280_s22 + $0x60] sm:$0xff] }
  0x16   : > { %v1343_v16 = vld [vmem:[%s1280_s22 + $0x88] sm:$0xff]  ;;  %v1346_v17 = vld [vmem:[%s1280_s22 + $0x80] sm:$0xff]  ;;  %v1349_v18 = vld [vmem:[%s1280_s22 + $0x78] sm:$0xff] }
  0x17   : > { %v1355_v19 = vld [vmem:[%s1280_s22 + $0xa0] sm:$0xff]  ;;  %v1358_v20 = vld [vmem:[%s1280_s22 + $0x98] sm:$0xff]  ;;  %v1361_v21 = vld [vmem:[%s1280_s22 + $0x90] sm:$0xff] }
  0x18   : > { %v1367_v22 = vld [vmem:[%s1280_s22 + $0xb8] sm:$0xff]  ;;  %v1370_v23 = vld [vmem:[%s1280_s22 + $0xb0] sm:$0xff]  ;;  %v1373_v24 = vld [vmem:[%s1280_s22 + $0xa8] sm:$0xff] }
  0x19   : > { %v1379_v25 = vld [vmem:[%s1280_s22 + $0xd0] sm:$0xff]  ;;  %v1382_v26 = vld [vmem:[%s1280_s22 + $0xc8] sm:$0xff]  ;;  %v1385_v27 = vld [vmem:[%s1280_s22 + $0xc0] sm:$0xff] }
  0x1a   : > { %306 = vperm.xlu2 %1193, %v1295_v4   ;;  %296 = vperm.xlu1 %1192, %v1298_v5   ;;  %v1391_v28 = vld [vmem:[%s1280_s22 + $0xe8] sm:$0xff]  ;;  %v1394_v29 = vld [vmem:[%s1280_s22 + $0xe0] sm:$0xff]  ;;  %v1397_v30 = vld [vmem:[%s1280_s22 + $0xd8] sm:$0xff] }
  0x1b   : > { %286 = vperm.xlu0 %1191, %v1301_v6   ;;  %v1403_v31 = vld [vmem:[%s1280_s22 + $0xf8] sm:$0xff]  ;;  %v1406_v32 = vld [vmem:[%s1280_s22 + $0xf0] sm:$0xff] }
  0x1c   : > { %1996 = vst [vmem:[#allocation2_spill] sm:$0xff] %v1403_v31 }
  0x22   : > { %321 = vperm.xlu2 %1193, %v1307_v7   ;;  %316 = vperm.xlu1 %1192, %v1310_v8  }
  0x23   : > { %311 = vperm.xlu0 %1191, %v1313_v9  }
  0x2a   : > { %336 = vperm.xlu2 %1193, %v1319_v10   ;;  %331 = vperm.xlu1 %1192, %v1322_v11  }
  0x2b   : > { %326 = vperm.xlu0 %1191, %v1325_v12  }
  0x32   : > { %351 = vperm.xlu2 %1193, %v1331_v13   ;;  %346 = vperm.xlu1 %1192, %v1334_v14  }
  0x33   : > { %341 = vperm.xlu0 %1191, %v1337_v15  }
  0x3a   : > { %366 = vperm.xlu2 %1193, %v1343_v16   ;;  %361 = vperm.xlu1 %1192, %v1346_v17  }
  0x3b   : > { %356 = vperm.xlu0 %1191, %v1349_v18  }
  0x42   : > { %381 = vperm.xlu2 %1193, %v1355_v19   ;;  %376 = vperm.xlu1 %1192, %v1358_v20  }
  0x43   : > { %371 = vperm.xlu0 %1191, %v1361_v21  }
  0x4a   : > { %396 = vperm.xlu2 %1193, %v1367_v22   ;;  %391 = vperm.xlu1 %1192, %v1370_v23  }
  0x4b   : > { %386 = vperm.xlu0 %1191, %v1373_v24  }
  0x52   : > { %411 = vperm.xlu2 %1193, %v1379_v25   ;;  %406 = vperm.xlu1 %1192, %v1382_v26  }
  0x53   : > { %401 = vperm.xlu0 %1191, %v1385_v27  }
  0x5a   : > { %426 = vperm.xlu2 %1193, %v1391_v28   ;;  %421 = vperm.xlu1 %1192, %v1394_v29  }
  0x5b   : > { %416 = vperm.xlu0 %1191, %v1397_v30  }
  0x62   : > { %1194 = vset.pattern.permute.xlu2 %v1226_v33  ;;  %436 = vperm.xlu1 %1192, %v1403_v31  }
  0x63   : > { %431 = vperm.xlu0 %1191, %v1406_v32   ;;  %473 = vperm.xlu2 %1194, %v1289_v3  }
  0x6a   : > { %1196 = vset.pattern.permute.xlu1 %v1226_v33 }
  0x6b   : > { %1195 = vset.pattern.permute.xlu0 %v1226_v33  ;;  %481 = vperm.xlu1 %1196, %v1286_v2  }
  0x6c   : > { %485 = vperm.xlu2 %1194, %v1298_v5   ;;  %477 = vperm.xlu0 %1195, %v1301_v6   ;;  %v1414_v34 = vpop.permute.xlu2 %301 }
  0x73   : > { %489 = vperm.xlu1 %1196, %v1283_v1  }
  0x74   : > { %493 = vperm.xlu2 %1194, %v1295_v4   ;;  %497 = vperm.xlu0 %1195, %v1313_v9   ;;  %v1419_v35 = vpop.permute.xlu2 %306 }
  0x7b   : > { %501 = vperm.xlu1 %1196, %v1310_v8  }
  0x7c   : > { %505 = vperm.xlu2 %1194, %v1307_v7   ;;  %509 = vperm.xlu0 %1195, %v1325_v12   ;;  %v1424_v36 = vpop.permute.xlu2 %321 }
  0x83   : > { %513 = vperm.xlu1 %1196, %v1322_v11  }
  0x84   : > { %517 = vperm.xlu2 %1194, %v1319_v10   ;;  %521 = vperm.xlu0 %1195, %v1337_v15   ;;  %v1429_v37 = vpop.permute.xlu2 %336  ;;  %v1431_v38 = vpop.permute.xlu1 %291 }
  0x85   : > { %v282_v39 = vpop.permute.xlu0 %281 }
  0x86   : > { %v440_v33 = vmul.f32 %v1495_v60, %v282_v39 }
  0x8b   : > { %525 = vperm.xlu1 %1196, %v1334_v14  }
  0x8c   : > { %529 = vperm.xlu2 %1194, %v1331_v13   ;;  %533 = vperm.xlu0 %1195, %v1349_v18   ;;  %v1436_v40 = vpop.permute.xlu2 %351  ;;  %v297_v41 = vpop.permute.xlu1 %296 }
  0x8d   : > { %v1438_v42 = vpop.permute.xlu0 %286 }
  0x93   : > { %537 = vperm.xlu1 %1196, %v1346_v17  }
  0x94   : > { %541 = vperm.xlu2 %1194, %v1343_v16   ;;  %545 = vperm.xlu0 %1195, %v1361_v21   ;;  %v1443_v43 = vpop.permute.xlu2 %366  ;;  %v1445_v44 = vpop.permute.xlu1 %316 }
  0x95   : > { %v1447_v45 = vpop.permute.xlu0 %311 }
  0x9b   : > { %549 = vperm.xlu1 %1196, %v1358_v20  }
  0x9c   : > { %553 = vperm.xlu2 %1194, %v1355_v19   ;;  %557 = vperm.xlu0 %1195, %v1373_v24   ;;  %v1452_v46 = vpop.permute.xlu2 %381  ;;  %v1454_v47 = vpop.permute.xlu1 %331 }
  0x9d   : > { %v1456_v48 = vpop.permute.xlu0 %326 }
  0xa3   : > { %561 = vperm.xlu1 %1196, %v1370_v23  }
  0xa4   : > { %565 = vperm.xlu2 %1194, %v1367_v22   ;;  %569 = vperm.xlu0 %1195, %v1385_v27   ;;  %v1461_v49 = vpop.permute.xlu2 %396  ;;  %v1463_v50 = vpop.permute.xlu1 %346 }
  0xa5   : > { %v1465_v51 = vpop.permute.xlu0 %341 }
  0xab   : > { %573 = vperm.xlu1 %1196, %v1382_v26  }
  0xac   : > { %577 = vperm.xlu2 %1194, %v1379_v25   ;;  %581 = vperm.xlu0 %1195, %v1397_v30   ;;  %v1470_v52 = vpop.permute.xlu2 %411  ;;  %v1472_v53 = vpop.permute.xlu1 %361 }
  0xad   : > { %v1474_v54 = vpop.permute.xlu0 %356 }
  0xb3   : > { %585 = vperm.xlu1 %1196, %v1394_v29  }
  0xb4   : > { %589 = vperm.xlu2 %1194, %v1391_v28   ;;  %593 = vperm.xlu0 %1195, %v1406_v32   ;;  %v1479_v55 = vpop.permute.xlu2 %426  ;;  %v1481_v56 = vpop.permute.xlu1 %376 }
  0xb5   : > { %1997 = vst [vmem:[#allocation3_spill] sm:$0xff] %v1479_v55  ;;  %v1483_v57 = vpop.permute.xlu0 %371 }
  0xbb   : > { %597 = vperm.xlu1 %1196, %v1403_v31  }
  0xbc   : > { %1197 = vset.pattern.permute.xlu2 %v1227_v61  ;;  %1198 = vset.pattern.permute.xlu0 %v1227_v61  ;;  %v1497_v62 = vpop.permute.xlu1 %391 }
  0xbd   : > { %1999 = vst [vmem:[#allocation5_spill] sm:$0xff] %v1497_v62  ;;  %666 = vperm.xlu2 %1197, %v1289_v3   ;;  %670 = vperm.xlu0 %1198, %v1301_v6   ;;  %v1501_v63 = vpop.permute.xlu0 %386  ;;  %v474_v0 = vpop.permute.xlu2 %473  ;;  %v443_v62 = vmul.f32 %v1495_v60, %v297_v41 }
  0xbe   : > { %2000 = vst [vmem:[#allocation6_spill] sm:$0xff] %v1501_v63  ;;  %v601_v55 = vmul.f32 %v1491_v59, %v474_v0 }
  0xc0   : > { %v1505_v31 = vadd.f32 %v601_v55, %v440_v33 }
  0xc3   : > { %1199 = vset.pattern.permute.xlu1 %v1227_v61 }
  0xc4   : > { %674 = vperm.xlu1 %1199, %v1286_v2   ;;  %v1508_v58 = vpop.permute.xlu1 %406 }
  0xc5   : > { %678 = vperm.xlu2 %1197, %v1298_v5   ;;  %690 = vperm.xlu0 %1198, %v1313_v9   ;;  %v1512_v3 = vpop.permute.xlu0 %401  ;;  %v445_v9 = vmul.f32 %v1495_v60, %v1419_v35 }
  0xc6   : > { %v486_v6 = vpop.permute.xlu2 %485 }
  0xc7   : > { %v604_v39 = vmul.f32 %v1491_v59, %v486_v6 }
  0xc9   : > { %v1516_v63 = vadd.f32 %v604_v39, %v443_v62  ;;  %v441_v39 = vmul.f32 %v1495_v60, %v1438_v42 }
  0xcc   : > { %682 = vperm.xlu1 %1199, %v1283_v1   ;;  %v1519_v55 = vpop.permute.xlu1 %421 }
  0xcd   : > { %686 = vperm.xlu2 %1197, %v1295_v4   ;;  %702 = vperm.xlu0 %1198, %v1325_v12   ;;  %v1523_v2 = vpop.permute.xlu0 %416  ;;  %v448_v12 = vmul.f32 %v1495_v60, %v1424_v36  ;;  %v451_v36 = vmul.f32 %v1495_v60, %v1429_v37 }
  0xce   : > { %v494_v5 = vpop.permute.xlu2 %493 }
  0xcf   : > { %v606_v41 = vmul.f32 %v1491_v59, %v494_v5 }
  0xd1   : > { %v1528_v61 = vadd.f32 %v606_v41, %v445_v9 }
  0xd4   : > { %694 = vperm.xlu1 %1199, %v1310_v8   ;;  %v1531_v62 = vpop.permute.xlu1 %436 }
  0xd5   : > { %698 = vperm.xlu2 %1197, %v1307_v7   ;;  %714 = vperm.xlu0 %1198, %v1337_v15   ;;  %v1535_v1 = vpop.permute.xlu0 %431  ;;  %v442_v7 = vmul.f32 %v1495_v60, %v1431_v38  ;;  %v444_v38 = vmul.f32 %v1495_v60, %v1414_v34 }
  0xd6   : > { %v506_v4 = vpop.permute.xlu2 %505 }
  0xd7   : > { %v609_v35 = vmul.f32 %v1491_v59, %v506_v4 }
  0xd9   : > { %v1540_v0 = vadd.f32 %v609_v35, %v448_v12  ;;  %v454_v12 = vmul.f32 %v1495_v60, %v1436_v40  ;;  %v446_v35 = vmul.f32 %v1495_v60, %v1447_v45  ;;  %v447_v40 = vmul.f32 %v1495_v60, %v1445_v44 }
  0xda   : > { %v450_v44 = vmul.f32 %v1495_v60, %v1454_v47  ;;  %v453_v47 = vmul.f32 %v1495_v60, %v1463_v50  ;;  %v456_v50 = vmul.f32 %v1495_v60, %v1472_v53 }
  0xdc   : > { %706 = vperm.xlu1 %1199, %v1322_v11  }
  0xdd   : > { %710 = vperm.xlu2 %1197, %v1319_v10   ;;  %726 = vperm.xlu0 %1198, %v1349_v18   ;;  %v482_v8 = vpop.permute.xlu1 %481 }
  0xde   : > { %v603_v15 = vmul.f32 %v1491_v59, %v482_v8  ;;  %v518_v33 = vpop.permute.xlu2 %517  ;;  %v478_v6 = vpop.permute.xlu0 %477 }
  0xdf   : > { %v612_v11 = vmul.f32 %v1491_v59, %v518_v33  ;;  %v602_v10 = vmul.f32 %v1491_v59, %v478_v6  ;;  %v457_v6 = vmul.f32 %v1495_v60, %v1443_v43 }
  0xe0   : > { %v1554_v5 = vadd.f32 %v603_v15, %v442_v7 }
  0xe1   : > { %v1556_v18 = vadd.f32 %v612_v11, %v451_v36  ;;  %v1558_v9 = vadd.f32 %v602_v10, %v441_v39  ;;  %v449_v36 = vmul.f32 %v1495_v60, %v1456_v48 }
  0xe4   : > { %718 = vperm.xlu1 %1199, %v1334_v14  }
  0xe5   : > { %722 = vperm.xlu2 %1197, %v1331_v13   ;;  %738 = vperm.xlu0 %1198, %v1361_v21   ;;  %v490_v37 = vpop.permute.xlu1 %489 }
  0xe6   : > { %v605_v42 = vmul.f32 %v1491_v59, %v490_v37  ;;  %v530_v41 = vpop.permute.xlu2 %529  ;;  %v498_v4 = vpop.permute.xlu0 %497 }
  0xe7   : > { %v615_v14 = vmul.f32 %v1491_v59, %v530_v41  ;;  %v607_v13 = vmul.f32 %v1491_v59, %v498_v4 }
  0xe8   : > { %v1572_v8 = vadd.f32 %v605_v42, %v444_v38  ;;  %v460_v38 = vmul.f32 %v1495_v60, %v1452_v46  ;;  %v452_v42 = vmul.f32 %v1495_v60, %v1465_v51 }
  0xe9   : > { %v1574_v21 = vadd.f32 %v615_v14, %v454_v12  ;;  %v1576_v7 = vadd.f32 %v607_v13, %v446_v35  ;;  %v463_v14 = vmul.f32 %v1495_v60, %v1461_v49  ;;  %v455_v13 = vmul.f32 %v1495_v60, %v1474_v54 }
  0xec   : > { %730 = vperm.xlu1 %1199, %v1346_v17  }
  0xed   : > { %734 = vperm.xlu2 %1197, %v1343_v16   ;;  %750 = vperm.xlu0 %1198, %v1373_v24   ;;  %v502_v34 = vpop.permute.xlu1 %501 }
  0xee   : > { %v608_v45 = vmul.f32 %v1491_v59, %v502_v34  ;;  %v542_v15 = vpop.permute.xlu2 %541  ;;  %v510_v33 = vpop.permute.xlu0 %509 }
  0xef   : > { %v618_v17 = vmul.f32 %v1491_v59, %v542_v15  ;;  %v610_v16 = vmul.f32 %v1491_v59, %v510_v33  ;;  %v466_v33 = vmul.f32 %v1495_v60, %v1470_v52  ;;  %v459_v52 = vmul.f32 %v1495_v60, %v1481_v56  ;;  %v2003_v56 = vld [vmem:[#allocation2_spill] sm:$0xff] }
  0xf0   : > { %v1590_v39 = vadd.f32 %v608_v45, %v447_v40 }
  0xf1   : > { %v1592_v24 = vadd.f32 %v618_v17, %v457_v6  ;;  %v1594_v11 = vadd.f32 %v610_v16, %v449_v36  ;;  %v458_v6 = vmul.f32 %v1495_v60, %v1483_v57 }
  0xf4   : > { %742 = vperm.xlu1 %1199, %v1358_v20  }
  0xf5   : > { %746 = vperm.xlu2 %1197, %v1355_v19   ;;  %762 = vperm.xlu0 %1198, %v1385_v27   ;;  %v514_v43 = vpop.permute.xlu1 %513 }
  0xf6   : > { %v611_v48 = vmul.f32 %v1491_v59, %v514_v43  ;;  %v554_v10 = vpop.permute.xlu2 %553  ;;  %v522_v37 = vpop.permute.xlu0 %521 }
  0xf7   : > { %v621_v20 = vmul.f32 %v1491_v59, %v554_v10  ;;  %v613_v19 = vmul.f32 %v1491_v59, %v522_v37  ;;  %v2002_v10 = vld [vmem:[#allocation6_spill] sm:$0xff] }
  0xf8   : > { %v1608_v41 = vadd.f32 %v611_v48, %v450_v44  ;;  %v2001_v44 = vld [vmem:[#allocation3_spill] sm:$0xff]  ;;  %v461_v37 = vmul.f32 %v1495_v60, %v2002_v10 }
  0xf9   : > { %v1610_v27 = vadd.f32 %v621_v20, %v460_v38  ;;  %v1612_v4 = vadd.f32 %v613_v19, %v452_v42  ;;  %v469_v48 = vmul.f32 %v1495_v60, %v2001_v44  ;;  %v2004_v19 = vld [vmem:[#allocation4_spill] sm:$0xff] }
  0xfc   : > { %754 = vperm.xlu1 %1199, %v1370_v23  }
  0xfd   : > { %758 = vperm.xlu2 %1197, %v1367_v22   ;;  %774 = vperm.xlu0 %1198, %v1397_v30   ;;  %v526_v46 = vpop.permute.xlu1 %525 }
  0xfe   : > { %v614_v51 = vmul.f32 %v1491_v59, %v526_v46  ;;  %v566_v12 = vpop.permute.xlu2 %565  ;;  %v534_v35 = vpop.permute.xlu0 %533  ;;  %v1669_v46 = vperm.slane %v2004_v19, 2 }
  0xff   : > { %v624_v23 = vmul.f32 %v1491_v59, %v566_v12  ;;  %v616_v22 = vmul.f32 %v1491_v59, %v534_v35 }
 0x100   : > { %v1626_v34 = vadd.f32 %v614_v51, %v453_v47  ;;  %v2005_v51 = vld [vmem:[#allocation5_spill] sm:$0xff] }
 0x101   : > { %v1628_v30 = vadd.f32 %v624_v23, %v463_v14  ;;  %v1630_v40 = vadd.f32 %v616_v22, %v455_v13  ;;  %v462_v12 = vmul.f32 %v1495_v60, %v2005_v51  ;;  %v464_v13 = vmul.f32 %v1495_v60, %v1512_v3 }
 0x104   : > { %766 = vperm.xlu1 %1199, %v1382_v26  }
 0x105   : > { %770 = vperm.xlu2 %1197, %v1379_v25   ;;  %786 = vperm.xlu0 %1198, %v1406_v32   ;;  %v538_v49 = vpop.permute.xlu1 %537 }
 0x106   : > { %v617_v54 = vmul.f32 %v1491_v59, %v538_v49  ;;  %v578_v45 = vpop.permute.xlu2 %577  ;;  %v546_v15 = vpop.permute.xlu0 %545 }
 0x107   : > { %v627_v26 = vmul.f32 %v1491_v59, %v578_v45  ;;  %v619_v25 = vmul.f32 %v1491_v59, %v546_v15 }
 0x108   : > { %v1644_v36 = vadd.f32 %v617_v54, %v456_v50  ;;  %v1682_v50 = vld [vmem:[%s1991_s2] ss:$0 sm:$0xff] }
 0x109   : > { %v1646_v32 = vadd.f32 %v627_v26, %v466_v33  ;;  %v1648_v17 = vadd.f32 %v619_v25, %v458_v6  ;;  %v465_v6 = vmul.f32 %v1495_v60, %v1508_v58 }
 0x10c   : > { %778 = vperm.xlu1 %1199, %v1394_v29  }
 0x10d   : > { %782 = vperm.xlu2 %1197, %v1391_v28   ;;  %v550_v53 = vpop.permute.xlu1 %549 }
 0x10e   : > { %v620_v57 = vmul.f32 %v1491_v59, %v550_v53  ;;  %v590_v16 = vpop.permute.xlu2 %589  ;;  %v558_v43 = vpop.permute.xlu0 %557 }
 0x10f   : > { %v630_v38 = vmul.f32 %v1491_v59, %v590_v16  ;;  %v622_v29 = vmul.f32 %v1491_v59, %v558_v43 }
 0x110   : > { %v1661_v42 = vadd.f32 %v620_v57, %v459_v52 }
 0x111   : > { %v1663_v28 = vadd.f32 %v630_v38, %v469_v48  ;;  %v1665_v20 = vadd.f32 %v622_v29, %v461_v37 }
 0x114   : > { %790 = vperm.xlu1 %1199, %v2003_v56   ;;  %v470_v56 = vmul.f32 %v1495_v60, %v1535_v1  ;;  %v471_v1 = vmul.f32 %v1495_v60, %v1531_v62 }
 0x115   : > { %v562_v47 = vpop.permute.xlu1 %561 }
 0x116   : > { %v623_v35 = vmul.f32 %v1491_v59, %v562_v47  ;;  %v570_v14 = vpop.permute.xlu0 %569 }
 0x117   : > { %v625_v23 = vmul.f32 %v1491_v59, %v570_v14  ;;  %v667_v22 = vpop.permute.xlu2 %666 }
 0x118   : > { %v1677_v49 = vadd.f32 %v623_v35, %v462_v12  ;;  %v794_v54 = vmul.f32 %v1669_v46, %v667_v22 }
 0x119   : > { %v1685_v45 = vadd.f32 %v625_v23, %v464_v13 }
 0x11a   : > { %v826_v15 = vadd.f32 %v794_v54, %v1505_v31  ;;  %v467_v31 = vmul.f32 %v1495_v60, %v1523_v2  ;;  %v468_v2 = vmul.f32 %v1495_v60, %v1519_v55 }
 0x11c   : > { %v862_v33 = vadd.f32 %v1682_v50, %v826_v15 }
 0x11d   : > { %v574_v3 = vpop.permute.xlu1 %573 }
 0x11e   : > { %v894_v26 = vmax.f32 %v862_v33, 0.0  ;;  %v626_v25 = vmul.f32 %v1491_v59, %v574_v3  ;;  %v582_v53 = vpop.permute.xlu0 %581 }
 0x11f   : > { %v628_v52 = vmul.f32 %v1491_v59, %v582_v53  ;;  %v679_v57 = vpop.permute.xlu2 %678 }
 0x120   : > { %927 = vst.msk [vmem:[%s1694_s29] sm:$0xff] %vm926_vm0, %v894_v26  ;;  %v1704_v16 = vadd.f32 %v626_v25, %v465_v6  ;;  %v797_v43 = vmul.f32 %v1669_v46, %v679_v57 }
 0x121   : > { %v1707_v44 = vadd.f32 %v628_v52, %v467_v31 }
 0x122   : > { %v829_v58 = vadd.f32 %v797_v43, %v1516_v63  ;;  %v966_v43 = vsel %vm926_vm0, %v894_v26, 0.0 }
 0x124   : > { %v865_v48 = vadd.f32 %v1682_v50, %v829_v58 }
 0x125   : > { %v586_v10 = vpop.permute.xlu1 %585 }
 0x126   : > { %v897_v37 = vmax.f32 %v865_v48, 0.0  ;;  %v629_v38 = vmul.f32 %v1491_v59, %v586_v10  ;;  %v594_v29 = vpop.permute.xlu0 %593 }
 0x127   : > { %v631_v19 = vmul.f32 %v1491_v59, %v594_v29  ;;  %v687_v47 = vpop.permute.xlu2 %686 }
 0x128   : > { %930 = vst.msk [vmem:[%s1694_s29 + $0x18] sm:$0xff] %vm926_vm0, %v897_v37  ;;  %v1719_v63 = vadd.f32 %v629_v38, %v468_v2  ;;  %v799_v51 = vmul.f32 %v1669_v46, %v687_v47 }
 0x129   : > { %v1722_v12 = vadd.f32 %v631_v19, %v470_v56 }
 0x12a   : > { %v831_v55 = vadd.f32 %v799_v51, %v1528_v61 }
 0x12c   : > { %v1726_v35 = vadd.f32 %v1682_v50, %v831_v55 }
 0x12d   : > { %v598_v14 = vpop.permute.xlu1 %597 }
 0x12e   : > { %v899_v13 = vmax.f32 %v1726_v35, 0.0  ;;  %v632_v23 = vmul.f32 %v1491_v59, %v598_v14 }
 0x12f   : > { %v699_v22 = vpop.permute.xlu2 %698  ;;  %v671_v54 = vpop.permute.xlu0 %670 }
 0x130   : > { %932 = vst.msk [vmem:[%s1694_s29 + $0x28] sm:$0xff] %vm926_vm0, %v899_v13  ;;  %v1736_v15 = vadd.f32 %v632_v23, %v471_v1  ;;  %v802_v61 = vmul.f32 %v1669_v46, %v699_v22  ;;  %v795_v33 = vmul.f32 %v1669_v46, %v671_v54  ;;  %v971_v22 = vsel %vm926_vm0, %v897_v37, 0.0 }
 0x132   : > { %v834_v60 = vadd.f32 %v802_v61, %v1540_v0  ;;  %v827_v62 = vadd.f32 %v795_v33, %v1558_v9 }
 0x134   : > { %v1743_v59 = vadd.f32 %v1682_v50, %v834_v60  ;;  %v863_v3 = vadd.f32 %v1682_v50, %v827_v62 }
 0x136   : > { %v902_v6 = vmax.f32 %v1743_v59, 0.0  ;;  %v895_v25 = vmax.f32 %v863_v3, 0.0  ;;  %v675_v53 = vpop.permute.xlu1 %674 }
 0x137   : > { %v796_v31 = vmul.f32 %v1669_v46, %v675_v53  ;;  %v711_v52 = vpop.permute.xlu2 %710  ;;  %v691_v57 = vpop.permute.xlu0 %690 }
 0x138   : > { %935 = vst.msk [vmem:[%s1694_s29 + $0x40] sm:$0xff] %vm926_vm0, %v902_v6  ;;  %v967_v0 = vsel %vm926_vm0, %v895_v25, 0.0  ;;  %v805_v9 = vmul.f32 %v1669_v46, %v711_v52  ;;  %v800_v58 = vmul.f32 %v1669_v46, %v691_v57 }
 0x139   : > { %928 = vst.msk [vmem:[%s1694_s29 + $0x8] sm:$0xff] %vm926_vm0, %v895_v25  ;;  %v968_v48 = vadd.f32 %v967_v0, %v966_v43  ;;  %v828_v10 = vadd.f32 %v796_v31, %v1554_v5 }
 0x13a   : > { %v837_v2 = vadd.f32 %v805_v9, %v1556_v18  ;;  %v832_v26 = vadd.f32 %v800_v58, %v1576_v7 }
 0x13b   : > { %v864_v38 = vadd.f32 %v1682_v50, %v828_v10 }
 0x13c   : > { %v1763_v29 = vadd.f32 %v1682_v50, %v837_v2  ;;  %v868_v56 = vadd.f32 %v1682_v50, %v832_v26 }
 0x13d   : > { %v896_v19 = vmax.f32 %v864_v38, 0.0 }
 0x13e   : > { %v905_v47 = vmax.f32 %v1763_v29, 0.0  ;;  %v900_v51 = vmax.f32 %v868_v56, 0.0  ;;  %v683_v55 = vpop.permute.xlu1 %682 }
 0x13f   : > { %929 = vst.msk [vmem:[%s1694_s29 + $0x10] sm:$0xff] %vm926_vm0, %v896_v19  ;;  %v969_v5 = vsel %vm926_vm0, %v896_v19, 0.0  ;;  %v798_v18 = vmul.f32 %v1669_v46, %v683_v55  ;;  %v723_v7 = vpop.permute.xlu2 %722  ;;  %v703_v14 = vpop.permute.xlu0 %702 }
 0x140   : > { %v970_v1 = vadd.f32 %v969_v5, %v968_v48  ;;  %938 = vst.msk [vmem:[%s1694_s29 + $0x58] sm:$0xff] %vm926_vm0, %v905_v47  ;;  %v808_v23 = vmul.f32 %v1669_v46, %v723_v7  ;;  %v803_v61 = vmul.f32 %v1669_v46, %v703_v14  ;;  %v975_v48 = vsel %vm926_vm0, %v899_v13, 0.0 }
 0x141   : > { %933 = vst.msk [vmem:[%s1694_s29 + $0x30] sm:$0xff] %vm926_vm0, %v900_v51  ;;  %v830_v54 = vadd.f32 %v798_v18, %v1572_v8  ;;  %v977_v56 = vsel %vm926_vm0, %v900_v51, 0.0 }
 0x142   : > { %v972_v33 = vadd.f32 %v971_v22, %v970_v1  ;;  %v840_v60 = vadd.f32 %v808_v23, %v1574_v21  ;;  %v835_v3 = vadd.f32 %v803_v61, %v1594_v11  ;;  %v981_v22 = vsel %vm926_vm0, %v902_v6, 0.0 }
 0x143   : > { %v866_v62 = vadd.f32 %v1682_v50, %v830_v54 }
 0x144   : > { %v1785_v25 = vadd.f32 %v1682_v50, %v840_v60  ;;  %v871_v37 = vadd.f32 %v1682_v50, %v835_v3 }
 0x145   : > { %v898_v53 = vmax.f32 %v866_v62, 0.0 }
 0x146   : > { %v908_v31 = vmax.f32 %v1785_v25, 0.0  ;;  %v695_v8 = vpop.permute.xlu1 %694  ;;  %v903_v57 = vmax.f32 %v871_v37, 0.0 }
 0x147   : > { %931 = vst.msk [vmem:[%s1694_s29 + $0x20] sm:$0xff] %vm926_vm0, %v898_v53  ;;  %v973_v52 = vsel %vm926_vm0, %v898_v53, 0.0  ;;  %v801_v21 = vmul.f32 %v1669_v46, %v695_v8  ;;  %v735_v43 = vpop.permute.xlu2 %734  ;;  %v715_v0 = vpop.permute.xlu0 %714 }
 0x148   : > { %v974_v11 = vadd.f32 %v973_v52, %v972_v33  ;;  %941 = vst.msk [vmem:[%s1694_s29 + $0x70] sm:$0xff] %vm926_vm0, %v908_v31  ;;  %v811_v9 = vmul.f32 %v1669_v46, %v735_v43  ;;  %v806_v58 = vmul.f32 %v1669_v46, %v715_v0  ;;  %v983_v62 = vsel %vm926_vm0, %v903_v57, 0.0 }
 0x149   : > { %936 = vst.msk [vmem:[%s1694_s29 + $0x48] sm:$0xff] %vm926_vm0, %v903_v57  ;;  %v833_v10 = vadd.f32 %v801_v21, %v1590_v39 }
 0x14a   : > { %v976_v2 = vadd.f32 %v975_v48, %v974_v11  ;;  %v843_v26 = vadd.f32 %v811_v9, %v1592_v24  ;;  %v838_v38 = vadd.f32 %v806_v58, %v1612_v4  ;;  %v987_v58 = vsel %vm926_vm0, %v905_v47, 0.0 }
 0x14b   : > { %v869_v19 = vadd.f32 %v1682_v50, %v833_v10 }
 0x14c   : > { %v978_v55 = vadd.f32 %v977_v56, %v976_v2  ;;  %v1810_v35 = vadd.f32 %v1682_v50, %v843_v26  ;;  %v874_v13 = vadd.f32 %v1682_v50, %v838_v38 }
 0x14d   : > { %v901_v5 = vmax.f32 %v869_v19, 0.0 }
 0x14e   : > { %v911_v39 = vmax.f32 %v1810_v35, 0.0  ;;  %v906_v18 = vmax.f32 %v874_v13, 0.0  ;;  %v707_v7 = vpop.permute.xlu1 %706 }
 0x14f   : > { %934 = vst.msk [vmem:[%s1694_s29 + $0x38] sm:$0xff] %vm926_vm0, %v901_v5  ;;  %v979_v24 = vsel %vm926_vm0, %v901_v5, 0.0  ;;  %v804_v4 = vmul.f32 %v1669_v46, %v707_v7  ;;  %v747_v51 = vpop.permute.xlu2 %746  ;;  %v727_v14 = vpop.permute.xlu0 %726 }
 0x150   : > { %v980_v1 = vadd.f32 %v979_v24, %v978_v55  ;;  %944 = vst.msk [vmem:[%s1694_s29 + $0x88] sm:$0xff] %vm926_vm0, %v911_v39  ;;  %v814_v23 = vmul.f32 %v1669_v46, %v747_v51  ;;  %v809_v61 = vmul.f32 %v1669_v46, %v727_v14  ;;  %v989_v38 = vsel %vm926_vm0, %v906_v18, 0.0 }
 0x151   : > { %939 = vst.msk [vmem:[%s1694_s29 + $0x60] sm:$0xff] %vm926_vm0, %v906_v18  ;;  %v836_v54 = vadd.f32 %v804_v4, %v1608_v41  ;;  %v993_v51 = vsel %vm926_vm0, %v908_v31, 0.0 }
 0x152   : > { %v982_v33 = vadd.f32 %v981_v22, %v980_v1  ;;  %v846_v60 = vadd.f32 %v814_v23, %v1610_v27  ;;  %v841_v53 = vadd.f32 %v809_v61, %v1630_v40 }
 0x153   : > { %v872_v3 = vadd.f32 %v1682_v50, %v836_v54 }
 0x154   : > { %v984_v59 = vadd.f32 %v983_v62, %v982_v33  ;;  %v1835_v37 = vadd.f32 %v1682_v50, %v846_v60  ;;  %v877_v41 = vadd.f32 %v1682_v50, %v841_v53 }
 0x155   : > { %v904_v6 = vmax.f32 %v872_v3, 0.0 }
 0x156   : > { %v914_v8 = vmax.f32 %v1835_v37, 0.0  ;;  %v719_v52 = vpop.permute.xlu1 %718  ;;  %v909_v57 = vmax.f32 %v877_v41, 0.0 }
 0x157   : > { %937 = vst.msk [vmem:[%s1694_s29 + $0x50] sm:$0xff] %vm926_vm0, %v904_v6  ;;  %v985_v27 = vsel %vm926_vm0, %v904_v6, 0.0  ;;  %v807_v21 = vmul.f32 %v1669_v46, %v719_v52  ;;  %v759_v43 = vpop.permute.xlu2 %758  ;;  %v739_v40 = vpop.permute.xlu0 %738 }
 0x158   : > { %v986_v0 = vadd.f32 %v985_v27, %v984_v59  ;;  %947 = vst.msk [vmem:[%s1694_s29 + $0xa0] sm:$0xff] %vm926_vm0, %v914_v8  ;;  %v817_v11 = vmul.f32 %v1669_v46, %v759_v43  ;;  %v812_v9 = vmul.f32 %v1669_v46, %v739_v40  ;;  %v995_v54 = vsel %vm926_vm0, %v909_v57, 0.0 }
 0x159   : > { %942 = vst.msk [vmem:[%s1694_s29 + $0x78] sm:$0xff] %vm926_vm0, %v909_v57  ;;  %v839_v48 = vadd.f32 %v807_v21, %v1626_v34  ;;  %v999_v57 = vsel %vm926_vm0, %v911_v39, 0.0 }
 0x15a   : > { %v988_v10 = vadd.f32 %v987_v58, %v986_v0  ;;  %v849_v2 = vadd.f32 %v817_v11, %v1628_v30  ;;  %v844_v26 = vadd.f32 %v812_v9, %v1648_v17  ;;  %v1228_v58 = vmov 0.0  }
 0x15b   : > { %v875_v56 = vadd.f32 %v1682_v50, %v839_v48  ;;  %964 = vst.msk [vmem:[%s1909_s6] sm:$0x1] %vm963_vm1, %v1228_v58 }
 0x15c   : > { %v990_v19 = vadd.f32 %v989_v38, %v988_v10  ;;  %v1860_v29 = vadd.f32 %v1682_v50, %v849_v2  ;;  %v880_v47 = vadd.f32 %v1682_v50, %v844_v26 }
 0x15d   : > { %v907_v55 = vmax.f32 %v875_v56, 0.0 }
 0x15e   : > { %v917_v34 = vmax.f32 %v1860_v29, 0.0  ;;  %v912_v13 = vmax.f32 %v880_v47, 0.0  ;;  %v731_v5 = vpop.permute.xlu1 %730  ;;  %v1005_v47 = vsel %vm926_vm0, %v914_v8, 0.0 }
 0x15f   : > { %940 = vst.msk [vmem:[%s1694_s29 + $0x68] sm:$0xff] %vm926_vm0, %v907_v55  ;;  %v991_v30 = vsel %vm926_vm0, %v907_v55, 0.0  ;;  %v810_v17 = vmul.f32 %v1669_v46, %v731_v5  ;;  %v771_v18 = vpop.permute.xlu2 %770  ;;  %v751_v7 = vpop.permute.xlu0 %750 }
 0x160   : > { %v992_v24 = vadd.f32 %v991_v30, %v990_v19  ;;  %950 = vst.msk [vmem:[%s1694_s29 + $0xb8] sm:$0xff] %vm926_vm0, %v917_v34  ;;  %v820_v4 = vmul.f32 %v1669_v46, %v771_v18  ;;  %v815_v1 = vmul.f32 %v1669_v46, %v751_v7  ;;  %v1001_v35 = vsel %vm926_vm0, %v912_v13, 0.0 }
 0x161   : > { %945 = vst.msk [vmem:[%s1694_s29 + $0x90] sm:$0xff] %vm926_vm0, %v912_v13  ;;  %v842_v14 = vadd.f32 %v810_v17, %v1644_v36 }
 0x162   : > { %v994_v23 = vadd.f32 %v993_v51, %v992_v24  ;;  %v852_v22 = vadd.f32 %v820_v4, %v1646_v32  ;;  %v847_v33 = vadd.f32 %v815_v1, %v1665_v20  ;;  %v1011_v1 = vsel %vm926_vm0, %v917_v34, 0.0 }
 0x163   : > { %v878_v61 = vadd.f32 %v1682_v50, %v842_v14 }
 0x164   : > { %v996_v25 = vadd.f32 %v995_v54, %v994_v23  ;;  %v1885_v60 = vadd.f32 %v1682_v50, %v852_v22  ;;  %v883_v36 = vadd.f32 %v1682_v50, %v847_v33 }
 0x165   : > { %v910_v31 = vmax.f32 %v878_v61, 0.0 }
 0x166   : > { %v920_v62 = vmax.f32 %v1885_v60, 0.0  ;;  %v743_v3 = vpop.permute.xlu1 %742  ;;  %v915_v53 = vmax.f32 %v883_v36, 0.0 }
 0x167   : > { %943 = vst.msk [vmem:[%s1694_s29 + $0x80] sm:$0xff] %vm926_vm0, %v910_v31  ;;  %v997_v32 = vsel %vm926_vm0, %v910_v31, 0.0  ;;  %v813_v59 = vmul.f32 %v1669_v46, %v743_v3  ;;  %v783_v20 = vpop.permute.xlu2 %782  ;;  %v763_v6 = vpop.permute.xlu0 %762 }
 0x168   : > { %v998_v41 = vadd.f32 %v997_v32, %v996_v25  ;;  %953 = vst.msk [vmem:[%s1694_s29 + $0xd0] sm:$0xff] %vm926_vm0, %v920_v62  ;;  %v823_v52 = vmul.f32 %v1669_v46, %v783_v20  ;;  %v818_v27 = vmul.f32 %v1669_v46, %v763_v6  ;;  %v1007_v30 = vsel %vm926_vm0, %v915_v53, 0.0 }
 0x169   : > { %948 = vst.msk [vmem:[%s1694_s29 + $0xa8] sm:$0xff] %vm926_vm0, %v915_v53  ;;  %v845_v21 = vadd.f32 %v813_v59, %v1661_v42 }
 0x16a   : > { %v1000_v43 = vadd.f32 %v999_v57, %v998_v41  ;;  %v855_v40 = vadd.f32 %v823_v52, %v1663_v28  ;;  %v850_v0 = vadd.f32 %v818_v27, %v1685_v45 }
 0x16b   : > { %v881_v39 = vadd.f32 %v1682_v50, %v845_v21 }
 0x16c   : > { %v1002_v11 = vadd.f32 %v1001_v35, %v1000_v43  ;;  %v1916_v42 = vadd.f32 %v1682_v50, %v855_v40  ;;  %v886_v9 = vadd.f32 %v1682_v50, %v850_v0 }
 0x16d   : > { %v913_v48 = vmax.f32 %v881_v39, 0.0 }
 0x16e   : > { %v923_v28 = vmax.f32 %v1916_v42, 0.0  ;;  %v918_v45 = vmax.f32 %v886_v9, 0.0  ;;  %v755_v10 = vpop.permute.xlu1 %754 }
 0x16f   : > { %946 = vst.msk [vmem:[%s1694_s29 + $0x98] sm:$0xff] %vm926_vm0, %v913_v48  ;;  %v1003_v2 = vsel %vm926_vm0, %v913_v48, 0.0  ;;  %v816_v26 = vmul.f32 %v1669_v46, %v755_v10  ;;  %v775_v38 = vpop.permute.xlu0 %774 }
 0x170   : > { %v1004_v56 = vadd.f32 %v1003_v2, %v1002_v11  ;;  %956 = vst.msk [vmem:[%s1694_s29 + $0xe8] sm:$0xff] %vm926_vm0, %v923_v28  ;;  %v821_v19 = vmul.f32 %v1669_v46, %v775_v38  ;;  %v1013_v61 = vsel %vm926_vm0, %v918_v45, 0.0 }
 0x171   : > { %951 = vst.msk [vmem:[%s1694_s29 + $0xc0] sm:$0xff] %vm926_vm0, %v918_v45  ;;  %v848_v55 = vadd.f32 %v816_v26, %v1677_v49  ;;  %v965_v45 = vld [vmem:[%s1909_s6] sm:$0x1] }
 0x172   : > { %v1006_v13 = vadd.f32 %v1005_v47, %v1004_v56  ;;  %v853_v5 = vadd.f32 %v821_v19, %v1707_v44 }
 0x173   : > { %v884_v17 = vadd.f32 %v1682_v50, %v848_v55 }
 0x174   : > { %v1008_v18 = vadd.f32 %v1007_v30, %v1006_v13  ;;  %v889_v7 = vadd.f32 %v1682_v50, %v853_v5 }
 0x175   : > { %v916_v24 = vmax.f32 %v884_v17, 0.0 }
 0x176   : > { %v921_v4 = vmax.f32 %v889_v7, 0.0  ;;  %v767_v37 = vpop.permute.xlu1 %766 }
 0x177   : > { %949 = vst.msk [vmem:[%s1694_s29 + $0xb0] sm:$0xff] %vm926_vm0, %v916_v24  ;;  %v1009_v8 = vsel %vm926_vm0, %v916_v24, 0.0  ;;  %v819_v51 = vmul.f32 %v1669_v46, %v767_v37  ;;  %v787_v49 = vpop.permute.xlu0 %786 }
 0x178   : > { %v1010_v14 = vadd.f32 %v1009_v8, %v1008_v18  ;;  %954 = vst.msk [vmem:[%s1694_s29 + $0xd8] sm:$0xff] %vm926_vm0, %v921_v4  ;;  %v824_v44 = vmul.f32 %v1669_v46, %v787_v49  ;;  %v1019_v20 = vsel %vm926_vm0, %v921_v4, 0.0 }
 0x179   : > { %v851_v23 = vadd.f32 %v819_v51, %v1704_v16 }
 0x17a   : > { %v1012_v22 = vadd.f32 %v1011_v1, %v1010_v14  ;;  %v856_v54 = vadd.f32 %v824_v44, %v1722_v12  ;;  %v1017_v12 = vsel %vm926_vm0, %v920_v62, 0.0  ;;  %v1023_v62 = vsel %vm926_vm0, %v923_v28, 0.0 }
 0x17b   : > { %v887_v33 = vadd.f32 %v1682_v50, %v851_v23 }
 0x17c   : > { %v1014_v25 = vadd.f32 %v1013_v61, %v1012_v22  ;;  %v892_v31 = vadd.f32 %v1682_v50, %v856_v54 }
 0x17d   : > { %v919_v36 = vmax.f32 %v887_v33, 0.0 }
 0x17e   : > { %v924_v3 = vmax.f32 %v892_v31, 0.0  ;;  %v779_v32 = vpop.permute.xlu1 %778 }
 0x17f   : > { %952 = vst.msk [vmem:[%s1694_s29 + $0xc8] sm:$0xff] %vm926_vm0, %v919_v36  ;;  %v1015_v29 = vsel %vm926_vm0, %v919_v36, 0.0  ;;  %v822_v16 = vmul.f32 %v1669_v46, %v779_v32 }
 0x180   : > { %v1016_v34 = vadd.f32 %v1015_v29, %v1014_v25  ;;  %957 = vst.msk [vmem:[%s1694_s29 + $0xf0] sm:$0xff] %vm926_vm0, %v924_v3  ;;  %v1025_v40 = vsel %vm926_vm0, %v924_v3, 0.0 }
 0x181   : > { %v854_v53 = vadd.f32 %v822_v16, %v1719_v63 }
 0x182   : > { %v1018_v59 = vadd.f32 %v1017_v12, %v1016_v34 }
 0x183   : > { %v890_v6 = vadd.f32 %v1682_v50, %v854_v53 }
 0x184   : > { %v1020_v41 = vadd.f32 %v1019_v20, %v1018_v59 }
 0x185   : > { %v922_v52 = vmax.f32 %v890_v6, 0.0 }
 0x186   : > { %v791_v27 = vpop.permute.xlu1 %790 }
 0x187   : > { %955 = vst.msk [vmem:[%s1694_s29 + $0xe0] sm:$0xff] %vm926_vm0, %v922_v52  ;;  %v1021_v57 = vsel %vm926_vm0, %v922_v52, 0.0  ;;  %v825_v21 = vmul.f32 %v1669_v46, %v791_v27 }
 0x188   : > { %v1022_v60 = vadd.f32 %v1021_v57, %v1020_v41 }
 0x189   : > { %v857_v63 = vadd.f32 %v825_v21, %v1736_v15 }
 0x18a   : > { %v1024_v43 = vadd.f32 %v1023_v62, %v1022_v60 }
 0x18b   : > { %v893_v0 = vadd.f32 %v1682_v50, %v857_v63 }
 0x18c   : > { %v1026_v35 = vadd.f32 %v1025_v40, %v1024_v43 }
 0x18d   : > { %v925_v39 = vmax.f32 %v893_v0, 0.0 }
 0x18f   : > { %958 = vst.msk [vmem:[%s1694_s29 + $0xf8] sm:$0xff] %vm926_vm0, %v925_v39  ;;  %v1027_v11 = vsel %vm926_vm0, %v925_v39, 0.0 }
 0x190   : > { %v1028_v42 = vadd.f32 %v1027_v11, %v1026_v35 }
 0x192   : > { %v1029_v46 = vrot.slane %v1028_v42, 4 }
 0x194   : > { %v1030_v9 = vadd.f32 %v1029_v46, %v1028_v42 }
 0x196   : > { %v1031_v58 = vrot.slane %v1030_v9, 2 }
 0x198   : > { %v1032_v48 = vadd.f32 %v1031_v58, %v1030_v9 }
 0x19a   : > { %v1033_v28 = vrot.slane %v1032_v48, 1 }
 0x19c   : > { %v1034_v15 = vadd.f32 %v1033_v28, %v1032_v48 }
 0x19e   : > { %v1035_v10 = vadd.f32 %v1034_v15, %v965_v45 }
 0x1a0   : > { %1037 = vst.msk [vmem:[%s1909_s6] sm:$0x1] %vm963_vm1, %v1035_v10 }
 0x1a1 PF: > { %s15_s17 = sadd.s32 1, %s1223_s17   ;;  %s2006_s15 = smov %s1219_s16 }
 0x1a2   : > { %p12_p5 = scmp.ge.s32.totalorder %s15_s17, 4   ;;  %s2007_s16 = smov %s2009_s18 }
 0x1a4   :  { %14 = sbr.rel (!%p12_p5) target bundleno = 2 (0x2), region = 78 }

// kernel: retinanet_forward.5
= control target key start
LH: loop header
LB: loop body
LE: loop exit
PB: predicated region body
PF: predicated region fallthrough
CT: control target
= control target key end

     0   :  { %s596_s15 = smov 0   ;;  %s598_s16 = smov 0   ;;  %s696_s0 = inlined_call_operand.vmem [shape: f32[2,64,32], index: 0, kind: input, shape index: {}]   ;;  %s697_s1 = inlined_call_operand.vmem [shape: f32[32,32], index: 1, kind: input, shape index: {}]   ;;  %s698_s2 = inlined_call_operand.vmem [shape: f32[1,32], index: 2, kind: input, shape index: {}]   ;;  %s699_s3 = inlined_call_operand.vmem [shape: f32[2,64,32], index: 3, kind: output, shape index: {0}]   ;;  %s700_s4 = inlined_call_operand.vmem [shape: f32[2,1,32], index: 4, kind: output, shape index: {1}]  }
   0x1   :  { %s600_s17 = smov 0  }
   0x2 LB: > { %s27_s18 = sadd.s32 1, %s564_s16  ;;  %p491_p0 = scmp.ge.s32.totalorder %s568_s17, 1  ;;  %s568_s17 = sphi %s600_s17, %s15_s17   ;;  %s564_s16 = sphi %s598_s16, %s702_s16   ;;  %s560_s15 = sphi %s596_s15, %s701_s15  }
   0x3   : > { %p29_p1 = scmp.ge.s32.totalorder %s27_s18, 2  ;;  %p186_p2 = scmp.lt.s32.totalorder %s568_s17, 3 }
   0x5   : > { %s704_s18 = smov (%p29_p1, %s27_s18), 0  ;;  %p187_p3 = pnand %p491_p0, %p186_p2 }
   0x6   : > { %p224_p4 = scmp.lt.s32.totalorder (!%p187_p3), %s560_s15, 1 }
   0x7   : > { %190 = sbr.rel (%p187_p3) target bundleno = 188 (0xbc), region = 32 }
   0xc   : > { %v257_v0 = vld [vmem:[%s697_s1 + $0x18] sm:$0xff]  ;;  %v256_v1 = vld [vmem:[%s697_s1 + $0x10] sm:$0xff]  ;;  %v255_v2 = vld [vmem:[%s697_s1 + $0x8] sm:$0xff]  ;;  %s706_s15 = smov (!%p224_p4, %s560_s15), 1  ;;  %vm262_vm0 = vcmask 261120   ;;  %vm348_vm1 = vcmask 253952  }
   0xd   : > { %299 = vmatpush.msra.mxu0 %v257_v0  ;;  %509 = vmatpush.msra.mxu2 %v257_v0  ;;  %v254_v3 = vld [vmem:[%s697_s1] sm:$0xff]  ;;  %s506_s27 = sshll.u32 %s706_s15, 6  ;;  %s646_s7 = scalar_lea.vmem %s700_s4, %s706_s15  ;;  %v570_v12 = vmov 0.0  }
   0xe   : > { %508 = vmatpush.msra.mxu1 %v257_v0  ;;  %510 = vmatpush.msra.mxu3 %v257_v0  ;;  %s231_s30 = scalar_lea.vmem %s696_s0, %s506_s27  ;;  %349 = vst.msk [vmem:[%s646_s7] sm:$0x1] %vm348_vm1, %v570_v12  ;;  %v545_v13 = vld [vmem:[%s698_s2] ss:$0 sm:$0xff]  ;;  %s658_s12 = scalar_lea.vmem %s699_s3, %s506_s27 }
   0xf   : > { %300 = vmatpush.msra.mxu0 %v256_v1  ;;  %512 = vmatpush.msra.mxu2 %v256_v1  ;;  %v246_v4 = vld [vmem:[%s231_s30] sm:$0xff]  ;;  %v248_v6 = vld [vmem:[%s231_s30 + $0x10] sm:$0xff]  ;;  %v247_v8 = vld [vmem:[%s231_s30 + $0x8] sm:$0xff] }
  0x10   : > { %511 = vmatpush.msra.mxu1 %v256_v1  ;;  %513 = vmatpush.msra.mxu3 %v256_v1  ;;  %v250_v5 = vld [vmem:[%s231_s30 + $0x20] sm:$0xff]  ;;  %v252_v7 = vld [vmem:[%s231_s30 + $0x30] sm:$0xff]  ;;  %v251_v9 = vld [vmem:[%s231_s30 + $0x28] sm:$0xff] }
  0x11   : > { %301 = vmatpush.msra.mxu0 %v255_v2  ;;  %515 = vmatpush.msra.mxu2 %v255_v2  ;;  %v249_v10 = vld [vmem:[%s231_s30 + $0x18] sm:$0xff] }
  0x12   : > { %514 = vmatpush.msra.mxu1 %v255_v2  ;;  %516 = vmatpush.msra.mxu3 %v255_v2  ;;  %v253_v11 = vld [vmem:[%s231_s30 + $0x38] sm:$0xff] }
  0x13   : > { %302 = vmatpush.msra.mxu0 %v254_v3  ;;  %518 = vmatpush.msra.mxu2 %v254_v3 }
  0x14   : > { %496 = vmatmul.msk.f32.vlgmr.msra.gmra.mxu0 %vm262_vm0, %v246_v4  ;;  %500 = vmatmul.msk.f32.vlgmr.msra.gmra.mxu2 %vm262_vm0, %v250_v5 }
  0x15   : > { %517 = vmatpush.msra.mxu1 %v254_v3  ;;  %519 = vmatpush.msra.mxu3 %v254_v3  ;;  %v350_v58 = vld [vmem:[%s646_s7] sm:$0x1] }
  0x16   : > { %498 = vmatmul.msk.f32.vlgmr.msra.gmra.mxu1 %vm262_vm0, %v248_v6  ;;  %502 = vmatmul.msk.f32.vlgmr.msra.gmra.mxu3 %vm262_vm0, %v252_v7 }
  0x1c   : > { %497 = vmatmul.msk.f32.gmra.mxu0 %vm262_vm0, %v247_v8  ;;  %501 = vmatmul.msk.f32.gmra.mxu2 %vm262_vm0, %v251_v9 }
  0x1e   : > { %499 = vmatmul.msk.f32.gmra.mxu1 %vm262_vm0, %v249_v10  ;;  %503 = vmatmul.msk.f32.gmra.mxu3 %vm262_vm0, %v253_v11 }
  0x91   : > { %v304_v14 = vpop.f32.mrf.mxu0 }
  0x92   : > { %v305_v15 = vadd.f32 %v545_v13, %v304_v14 }
  0x93   : > { %v310_v16 = vpop.f32.mrf.mxu1 }
  0x94   : > { %v328_v17 = vmax.f32 %v305_v15, 0.0  ;;  %v311_v18 = vadd.f32 %v545_v13, %v310_v16 }
  0x96   : > { %336 = vst.msk [vmem:[%s658_s12] sm:$0xff] %vm262_vm0, %v328_v17  ;;  %v330_v19 = vmax.f32 %v311_v18, 0.0  ;;  %v351_v31 = vsel %vm262_vm0, %v328_v17, 0.0 }
  0x97   : > { %v316_v20 = vpop.f32.mrf.mxu2 }
  0x98   : > { %338 = vst.msk [vmem:[%s658_s12 + $0x10] sm:$0xff] %vm262_vm0, %v330_v19  ;;  %v317_v21 = vadd.f32 %v545_v13, %v316_v20  ;;  %v354_v36 = vsel %vm262_vm0, %v330_v19, 0.0 }
  0x99   : > { %v307_v22 = vpop.f32.mrf.mxu0  ;;  %v322_v23 = vpop.f32.mrf.mxu3 }
  0x9a   : > { %v308_v24 = vadd.f32 %v545_v13, %v307_v22  ;;  %v332_v25 = vmax.f32 %v317_v21, 0.0  ;;  %v323_v26 = vadd.f32 %v545_v13, %v322_v23 }
  0x9b   : > { %v313_v27 = vpop.f32.mrf.mxu1 }
  0x9c   : > { %v329_v28 = vmax.f32 %v308_v24, 0.0  ;;  %340 = vst.msk [vmem:[%s658_s12 + $0x20] sm:$0xff] %vm262_vm0, %v332_v25  ;;  %v314_v29 = vadd.f32 %v545_v13, %v313_v27  ;;  %v334_v30 = vmax.f32 %v323_v26, 0.0  ;;  %v358_v44 = vsel %vm262_vm0, %v332_v25, 0.0 }
  0x9e   : > { %337 = vst.msk [vmem:[%s658_s12 + $0x8] sm:$0xff] %vm262_vm0, %v329_v28  ;;  %v352_v32 = vsel %vm262_vm0, %v329_v28, 0.0  ;;  %v331_v33 = vmax.f32 %v314_v29, 0.0  ;;  %v362_v49 = vsel %vm262_vm0, %v334_v30, 0.0 }
  0x9f   : > { %v353_v34 = vadd.f32 %v352_v32, %v351_v31  ;;  %342 = vst.msk [vmem:[%s658_s12 + $0x30] sm:$0xff] %vm262_vm0, %v334_v30  ;;  %v319_v35 = vpop.f32.mrf.mxu2 }
  0xa0   : > { %339 = vst.msk [vmem:[%s658_s12 + $0x18] sm:$0xff] %vm262_vm0, %v331_v33  ;;  %v356_v37 = vsel %vm262_vm0, %v331_v33, 0.0  ;;  %v320_v38 = vadd.f32 %v545_v13, %v319_v35 }
  0xa1   : > { %v355_v39 = vadd.f32 %v354_v36, %v353_v34  ;;  %v325_v40 = vpop.f32.mrf.mxu3 }
  0xa2   : > { %v333_v41 = vmax.f32 %v320_v38, 0.0  ;;  %v326_v42 = vadd.f32 %v545_v13, %v325_v40 }
  0xa3   : > { %v357_v43 = vadd.f32 %v356_v37, %v355_v39 }
  0xa4   : > { %341 = vst.msk [vmem:[%s658_s12 + $0x28] sm:$0xff] %vm262_vm0, %v333_v41  ;;  %v360_v45 = vsel %vm262_vm0, %v333_v41, 0.0  ;;  %v335_v46 = vmax.f32 %v326_v42, 0.0 }
  0xa5   : > { %v359_v47 = vadd.f32 %v358_v44, %v357_v43 }
  0xa6   : > { %343 = vst.msk [vmem:[%s658_s12 + $0x38] sm:$0xff] %vm262_vm0, %v335_v46  ;;  %v364_v50 = vsel %vm262_vm0, %v335_v46, 0.0 }
  0xa7   : > { %v361_v48 = vadd.f32 %v360_v45, %v359_v47 }
  0xa9   : > { %v363_v51 = vadd.f32 %v362_v49, %v361_v48 }
  0xab   : > { %v365_v52 = vadd.f32 %v364_v50, %v363_v51 }
  0xad   : > { %v366_v53 = vrot.slane %v365_v52, 4 }
  0xaf   : > { %v367_v54 = vadd.f32 %v366_v53, %v365_v52 }
  0xb1   : > { %v368_v55 = vrot.slane %v367_v54, 2 }
  0xb3   : > { %v369_v56 = vadd.f32 %v368_v55, %v367_v54 }
  0xb5   : > { %v370_v57 = vrot.slane %v369_v56, 1 }
  0xb7   : > { %v371_v59 = vadd.f32 %v370_v57, %v369_v56 }
  0xb9   : > { %v372_v60 = vadd.f32 %v371_v59, %v350_v58 }
  0xbb   : > { %374 = vst.msk [vmem:[%s646_s7] sm:$0x1] %vm348_vm1, %v372_v60 }
  0xbc PF: > { %s15_s17 = sadd.s32 1, %s568_s17   ;;  %s701_s15 = smov %s564_s16 }
  0xbd   : > { %p12_p5 = scmp.ge.s32.totalorder %s15_s17, 4   ;;  %s702_s16 = smov %s704_s18 }
  0xbf   :  { %14 = sbr.rel (!%p12_p5) target bundleno = 2 (0x2), region = 78 }

// kernel: squeeze.7
= control target key start
LH: loop header
LB: loop body
LE: loop exit
PB: predicated region body
PF: predicated region fallthrough
CT: control target
= control target key end

     0   :  { %s130_s0 = inlined_call_operand.vmem [shape: f32[2,64], index: 0, kind: input, shape index: {}]   ;;  %s131_s1 = inlined_call_operand.hbm [shape: f32[2,8,8], index: 1, kind: output, shape index: {}]  }
   0x1   :  { %v5_v0 = vld [vmem:[%s130_s0] sm:$0x3] }
   0x2   :  { %6 = vst [vmem:[#allocation2] sm:$0x3] %v5_v0 }
   0x3   :  { %2 = vsyncpa [#allocation1], 0  ;;  %s98_s0 = smov 120   ;;  %s99_s8 = smov 104   ;;  %vm8_vm0 = vcmask 64512  }
   0x4   :  { %s100_s9 = smov 88   ;;  %s101_s10 = smov 112  }
   0x5   :  { %s102_s11 = smov 96   ;;  %s103_s12 = smov 80  }
   0x6   :  { %s104_s13 = smov 72   ;;  %s105_s14 = smov [#allocation0]  }
   0x7   :  { %s55_s15 = sshll.u32 %s105_s14, 4  ;;  %s57_s1 = sshll.u32 %s131_s1, 4  ;;  %s56_s15 = int_to_ptr.vmem [resolvable:$true] %s55_s15  ;;  %s58_s1 = int_to_ptr.hbm [resolvable:$true] %s57_s1 }
   0x9   :  { %v10_v1 = vld [vmem:[#allocation2] sm:$0x3]  }
   0xa   :  { %v22_v2 = vld [vmem:[#allocation2] sm:$0x3]   ;;  %11 = vrot.lane.b32.xlu0 %v10_v1, %s98_s0 }
   0xb   :  { %23 = vrot.lane.b32.xlu1 %v22_v2, %s99_s8  ;;  %v34_v3 = vld [vmem:[#allocation2] sm:$0x3]  }
   0xc   :  { %35 = vrot.lane.b32.xlu2 %v34_v3, %s100_s9  ;;  %v16_v4 = vld [vmem:[#allocation2] sm:$0x3]  }
   0xd   :  { %v28_v5 = vld [vmem:[#allocation2] sm:$0x3]  }
   0xe   :  { %v40_v6 = vld [vmem:[#allocation2] sm:$0x3]  }
   0xf   :  { %v46_v7 = vld [vmem:[#allocation2] sm:$0x3]  }
  0x10   :  { %v7_v9 = vld [vmem:[#allocation2] sm:$0x3]  }
  0x11   :  { %9 = vst.msk [vmem:[#allocation0] ss:$8 sm:$0x3] %vm8_vm0, %v7_v9  }
  0x12   :  { %17 = vrot.lane.b32.xlu0 %v16_v4, %s101_s10 }
  0x13   :  { %29 = vrot.lane.b32.xlu1 %v28_v5, %s102_s11 }
  0x14   :  { %41 = vrot.lane.b32.xlu2 %v40_v6, %s103_s12 }
  0x1a   :  { %47 = vrot.lane.b32.xlu0 %v46_v7, %s104_s13 }
  0x66   :  { %v36_v8 = vpop.permute.xlu2 %35  }
  0x67   :  { %39 = vst.msk [vmem:[#allocation0 + $0x5] ss:$8 sm:$0x3] %vm8_vm0, %v36_v8  }
  0x6e   :  { %v42_v10 = vpop.permute.xlu2 %41  }
  0x6f   :  { %45 = vst.msk [vmem:[#allocation0 + $0x6] ss:$8 sm:$0x3] %vm8_vm0, %v42_v10  }
  0x7c   :  { %v12_v11 = vpop.permute.xlu0 %11  }
  0x7d   :  { %v24_v12 = vpop.permute.xlu1 %23   ;;  %15 = vst.msk [vmem:[#allocation0 + $0x1] ss:$8 sm:$0x3] %vm8_vm0, %v12_v11  }
  0x7e   :  { %27 = vst.msk [vmem:[#allocation0 + $0x3] ss:$8 sm:$0x3] %vm8_vm0, %v24_v12  }
  0x84   :  { %v18_v13 = vpop.permute.xlu0 %17  }
  0x85   :  { %v30_v14 = vpop.permute.xlu1 %29   ;;  %21 = vst.msk [vmem:[#allocation0 + $0x2] ss:$8 sm:$0x3] %vm8_vm0, %v18_v13  }
  0x86   :  { %33 = vst.msk [vmem:[#allocation0 + $0x4] ss:$8 sm:$0x3] %vm8_vm0, %v30_v14  }
  0x8c   :  { %v48_v15 = vpop.permute.xlu0 %47  }
  0x8d   :  { %51 = vst.msk [vmem:[#allocation0 + $0x7] ss:$8 sm:$0x3] %vm8_vm0, %v48_v15  }
  0x8e   :  { %60 = dma.vmem_to_hbm [thread:$0]  %s56_s15, 256, %s58_s1, [#allocation1]  }
  0x8f   :  { %96 = dma.done.wait [#allocation1], 256  }
  0x90   :  { %97 = vsyncadd [#allocation1], 4294967040 }
  0x91   :  { %63 = vsyncpa [#allocation1], 1 }

// kernel: retinanet_forward.7
= control target key start
LH: loop header
LB: loop body
LE: loop exit
PB: predicated region body
PF: predicated region fallthrough
CT: control target
= control target key end

     0   :  { %s524_s12 = smov 0   ;;  %s526_s13 = smov 0   ;;  %s579_s0 = inlined_call_operand.vmem [shape: f32[2,64,32], index: 0, kind: input, shape index: {}]   ;;  %s580_s1 = inlined_call_operand.vmem [shape: f32[2,32,128], index: 1, kind: input, shape index: {}]   ;;  %s581_s2 = inlined_call_operand.vmem [shape: f32[1,128], index: 2, kind: input, shape index: {}]   ;;  %s582_s3 = inlined_call_operand.vmem [shape: f32[2,64,128], index: 3, kind: output, shape index: {}]  }
   0x1   :  { %s528_s14 = smov 0  }
   0x2 LB: > { %s25_s15 = sadd.s32 1, %s498_s13  ;;  %p423_p0 = scmp.ge.s32.totalorder %s502_s14, 1  ;;  %s502_s14 = sphi %s528_s14, %s13_s14   ;;  %s498_s13 = sphi %s526_s13, %s584_s13   ;;  %s494_s12 = sphi %s524_s12, %s583_s12  }
   0x3   : > { %p27_p1 = scmp.ge.s32.totalorder %s25_s15, 2  ;;  %p168_p2 = scmp.lt.s32.totalorder %s502_s14, 3 }
   0x5   : > { %s586_s15 = smov (%p27_p1, %s25_s15), 0  ;;  %p169_p3 = pnand %p423_p0, %p168_p2 }
   0x6   : > { %p206_p4 = scmp.lt.s32.totalorder (!%p169_p3), %s494_s12, 1 }
   0x7   : > { %172 = sbr.rel (%p169_p3) target bundleno = 167 (0xa7), region = 32 }
   0xc   : > { %s588_s12 = smov (!%p206_p4, %s494_s12), 1  ;;  %vm246_vm0 = vcmask 261120   ;;  %v479_v12 = vld [vmem:[%s581_s2] ss:$0 sm:$0xff] }
   0xd   : > { %s441_s16 = sshll.u32 %s588_s12, 5  ;;  %s440_s17 = sshll.u32 %s588_s12, 6 }
   0xe   : > { %s219_s20 = scalar_lea.vmem %s580_s1, %s441_s16  ;;  %s213_s23 = scalar_lea.vmem %s579_s0, %s440_s17 }
   0xf   : > { %v241_v0 = vld [vmem:[%s219_s20 + $0x18] sm:$0xff]  ;;  %v240_v1 = vld [vmem:[%s219_s20 + $0x10] sm:$0xff]  ;;  %v239_v2 = vld [vmem:[%s219_s20 + $0x8] sm:$0xff]  ;;  %s228_s28 = scalar_lea.vmem %s582_s3, %s440_s17 }
  0x10   : > { %444 = vmatpush.msra.mxu2 %v241_v0  ;;  %445 = vmatpush.msra.mxu3 %v241_v0  ;;  %v238_v3 = vld [vmem:[%s219_s20] sm:$0xff]  ;;  %v236_v5 = vld [vmem:[%s213_s23 + $0x30] sm:$0xff]  ;;  %v235_v8 = vld [vmem:[%s213_s23 + $0x28] sm:$0xff] }
  0x11   : > { %283 = vmatpush.msra.mxu0 %v241_v0  ;;  %443 = vmatpush.msra.mxu1 %v241_v0  ;;  %v234_v4 = vld [vmem:[%s213_s23 + $0x20] sm:$0xff]  ;;  %v232_v7 = vld [vmem:[%s213_s23 + $0x10] sm:$0xff]  ;;  %v237_v9 = vld [vmem:[%s213_s23 + $0x38] sm:$0xff] }
  0x12   : > { %447 = vmatpush.msra.mxu2 %v240_v1  ;;  %448 = vmatpush.msra.mxu3 %v240_v1  ;;  %v230_v6 = vld [vmem:[%s213_s23] sm:$0xff]  ;;  %v231_v10 = vld [vmem:[%s213_s23 + $0x8] sm:$0xff]  ;;  %v233_v11 = vld [vmem:[%s213_s23 + $0x18] sm:$0xff] }
  0x13   : > { %284 = vmatpush.msra.mxu0 %v240_v1  ;;  %446 = vmatpush.msra.mxu1 %v240_v1 }
  0x14   : > { %450 = vmatpush.msra.mxu2 %v239_v2  ;;  %451 = vmatpush.msra.mxu3 %v239_v2 }
  0x15   : > { %285 = vmatpush.msra.mxu0 %v239_v2  ;;  %449 = vmatpush.msra.mxu1 %v239_v2 }
  0x16   : > { %453 = vmatpush.msra.mxu2 %v238_v3  ;;  %454 = vmatpush.msra.mxu3 %v238_v3 }
  0x17   : > { %434 = vmatmul.msk.f32.vlgmr.msra.gmra.mxu2 %vm246_vm0, %v234_v4  ;;  %436 = vmatmul.msk.f32.vlgmr.msra.gmra.mxu3 %vm246_vm0, %v236_v5 }
  0x18   : > { %286 = vmatpush.msra.mxu0 %v238_v3  ;;  %452 = vmatpush.msra.mxu1 %v238_v3 }
  0x19   : > { %430 = vmatmul.msk.f32.vlgmr.msra.gmra.mxu0 %vm246_vm0, %v230_v6  ;;  %432 = vmatmul.msk.f32.vlgmr.msra.gmra.mxu1 %vm246_vm0, %v232_v7 }
  0x1f   : > { %435 = vmatmul.msk.f32.gmra.mxu2 %vm246_vm0, %v235_v8  ;;  %437 = vmatmul.msk.f32.gmra.mxu3 %vm246_vm0, %v237_v9 }
  0x21   : > { %431 = vmatmul.msk.f32.gmra.mxu0 %vm246_vm0, %v231_v10  ;;  %433 = vmatmul.msk.f32.gmra.mxu1 %vm246_vm0, %v233_v11 }
  0x96   : > { %v288_v13 = vpop.f32.mrf.mxu0  ;;  %v294_v14 = vpop.f32.mrf.mxu1 }
  0x97   : > { %v289_v15 = vadd.f32 %v479_v12, %v288_v13  ;;  %v295_v16 = vadd.f32 %v479_v12, %v294_v14 }
  0x99   : > { %312 = vst [vmem:[%s228_s28] sm:$0xff] %v289_v15 }
  0x9a   : > { %314 = vst [vmem:[%s228_s28 + $0x10] sm:$0xff] %v295_v16  ;;  %v300_v17 = vpop.f32.mrf.mxu2  ;;  %v306_v18 = vpop.f32.mrf.mxu3 }
  0x9b   : > { %v301_v19 = vadd.f32 %v479_v12, %v300_v17  ;;  %v307_v20 = vadd.f32 %v479_v12, %v306_v18 }
  0x9d   : > { %316 = vst [vmem:[%s228_s28 + $0x20] sm:$0xff] %v301_v19 }
  0x9e   : > { %318 = vst [vmem:[%s228_s28 + $0x30] sm:$0xff] %v307_v20  ;;  %v291_v21 = vpop.f32.mrf.mxu0  ;;  %v297_v22 = vpop.f32.mrf.mxu1 }
  0x9f   : > { %v292_v23 = vadd.f32 %v479_v12, %v291_v21  ;;  %v298_v24 = vadd.f32 %v479_v12, %v297_v22 }
  0xa1   : > { %313 = vst [vmem:[%s228_s28 + $0x8] sm:$0xff] %v292_v23 }
  0xa2   : > { %315 = vst [vmem:[%s228_s28 + $0x18] sm:$0xff] %v298_v24  ;;  %v303_v25 = vpop.f32.mrf.mxu2  ;;  %v309_v26 = vpop.f32.mrf.mxu3 }
  0xa3   : > { %v304_v27 = vadd.f32 %v479_v12, %v303_v25  ;;  %v310_v28 = vadd.f32 %v479_v12, %v309_v26 }
  0xa5   : > { %317 = vst [vmem:[%s228_s28 + $0x28] sm:$0xff] %v304_v27 }
  0xa6   : > { %319 = vst [vmem:[%s228_s28 + $0x38] sm:$0xff] %v310_v28 }
  0xa7 PF: > { %s13_s14 = sadd.s32 1, %s502_s14   ;;  %s583_s12 = smov %s498_s13 }
  0xa8   : > { %p10_p5 = scmp.ge.s32.totalorder %s13_s14, 4   ;;  %s584_s13 = smov %s586_s15 }
  0xaa   :  { %12 = sbr.rel (!%p10_p5) target bundleno = 2 (0x2), region = 65 }

// kernel: squeeze.6
= control target key start
LH: loop header
LB: loop body
LE: loop exit
PB: predicated region body
PF: predicated region fallthrough
CT: control target
= control target key end

     0   :  { %s144_s0 = inlined_call_operand.vmem [shape: f32[2,256], index: 0, kind: input, shape index: {}]   ;;  %s145_s1 = inlined_call_operand.hbm [shape: f32[2,16,16], index: 1, kind: output, shape index: {}]  }
   0x1   :  { %v73_v0 = vld [vmem:[%s144_s0 + $0x2] sm:$0x3]  ;;  %v9_v1 = vld [vmem:[%s144_s0] sm:$0x3] }
   0x2   :  { %8 = vst [vmem:[#allocation2 + $0x8] sm:$0x3] %v73_v0 }
   0x3   :  { %10 = vst [vmem:[#allocation2] sm:$0x3] %v9_v1 }
   0x4   :  { %2 = vsyncpa [#allocation1], 0  ;;  %s108_s0 = smov 112   ;;  %s109_s10 = smov 80   ;;  %vm12_vm0 = vcmask 130048  }
   0x5   :  { %s110_s11 = smov 48   ;;  %s111_s12 = smov 96  }
   0x6   :  { %s112_s13 = smov 64   ;;  %s113_s14 = smov 32  }
   0x7   :  { %s114_s15 = smov 16   ;;  %s115_s16 = smov [#allocation0]  }
   0x8   :  { %s64_s17 = sshll.u32 %s115_s16, 4  ;;  %s66_s1 = sshll.u32 %s145_s1, 4  ;;  %s65_s17 = int_to_ptr.vmem [resolvable:$true] %s64_s17  ;;  %s67_s1 = int_to_ptr.hbm [resolvable:$true] %s66_s1 }
   0x9   :  { %v15_v5 = vld [vmem:[#allocation2 + $0x8] sm:$0x3]  }
   0xa   :  { %v19_v2 = vld.sshfl [vmem:[#allocation2] sm:$0xff pattern:$0x99999180]   ;;  %18 = vst.msk [vmem:[#allocation0 + $0x8] ss:$16 sm:$0x3] %vm12_vm0, %v15_v5  }
   0xb   :  { %20 = vrot.lane.b32.xlu0 %v19_v2, %s108_s0  ;;  %32 = vrot.lane.b32.xlu1 %v19_v2, %s109_s10  ;;  %v11_v4 = vld [vmem:[#allocation2] sm:$0x3]  }
   0xc   :  { %44 = vrot.lane.b32.xlu2 %v19_v2, %s110_s11  ;;  %13 = vst.msk [vmem:[#allocation0] ss:$16 sm:$0x3] %vm12_vm0, %v11_v4  }
  0x13   :  { %26 = vrot.lane.b32.xlu0 %v19_v2, %s111_s12  ;;  %38 = vrot.lane.b32.xlu1 %v19_v2, %s112_s13 }
  0x14   :  { %50 = vrot.lane.b32.xlu2 %v19_v2, %s113_s14 }
  0x1b   :  { %56 = vrot.lane.b32.xlu0 %v19_v2, %s114_s15 }
  0x66   :  { %v45_v3 = vpop.permute.xlu2 %44  }
  0x67   :  { %48 = vst.msk [vmem:[#allocation0 + $0x5] ss:$8 sm:$0xf] %vm12_vm0, %v45_v3  }
  0x6e   :  { %v51_v6 = vpop.permute.xlu2 %50  }
  0x6f   :  { %54 = vst.msk [vmem:[#allocation0 + $0x6] ss:$8 sm:$0xf] %vm12_vm0, %v51_v6  }
  0x7d   :  { %v21_v7 = vpop.permute.xlu0 %20   ;;  %v33_v8 = vpop.permute.xlu1 %32  }
  0x7e   :  { %24 = vst.msk [vmem:[#allocation0 + $0x1] ss:$8 sm:$0xf] %vm12_vm0, %v21_v7  }
  0x7f   :  { %36 = vst.msk [vmem:[#allocation0 + $0x3] ss:$8 sm:$0xf] %vm12_vm0, %v33_v8  }
  0x85   :  { %v27_v9 = vpop.permute.xlu0 %26   ;;  %v39_v10 = vpop.permute.xlu1 %38  }
  0x86   :  { %30 = vst.msk [vmem:[#allocation0 + $0x2] ss:$8 sm:$0xf] %vm12_vm0, %v27_v9  }
  0x87   :  { %42 = vst.msk [vmem:[#allocation0 + $0x4] ss:$8 sm:$0xf] %vm12_vm0, %v39_v10  }
  0x8d   :  { %v57_v11 = vpop.permute.xlu0 %56  }
  0x8e   :  { %60 = vst.msk [vmem:[#allocation0 + $0x7] ss:$8 sm:$0xf] %vm12_vm0, %v57_v11  }
  0x8f   :  { %69 = dma.vmem_to_hbm [thread:$0]  %s65_s17, 512, %s67_s1, [#allocation1]  }
  0x90   :  { %106 = dma.done.wait [#allocation1], 512  }
  0x91   :  { %107 = vsyncadd [#allocation1], 4294966784 }
  0x92   :  { %72 = vsyncpa [#allocation1], 1 }

// kernel: retinanet_forward.6
= control target key start
LH: loop header
LB: loop body
LE: loop exit
PB: predicated region body
PF: predicated region fallthrough
CT: control target
= control target key end

     0   :  { %s740_s12 = smov 0   ;;  %s742_s13 = smov 0   ;;  %s921_s0 = inlined_call_operand.vmem [shape: f32[2,256,32], index: 0, kind: input, shape index: {}]   ;;  %s922_s1 = inlined_call_operand.vmem [shape: f32[2,32,128], index: 1, kind: input, shape index: {}]   ;;  %s923_s2 = inlined_call_operand.vmem [shape: f32[1,128], index: 2, kind: input, shape index: {}]   ;;  %s924_s3 = inlined_call_operand.vmem [shape: f32[2,256,128], index: 3, kind: output, shape index: {}]  }
   0x1   :  { %s744_s14 = smov 0  }
   0x2 LB: > { %s25_s15 = sadd.s32 1, %s714_s13  ;;  %p615_p0 = scmp.ge.s32.totalorder %s718_s14, 1  ;;  %s718_s14 = sphi %s744_s14, %s13_s14   ;;  %s714_s13 = sphi %s742_s13, %s926_s13   ;;  %s710_s12 = sphi %s740_s12, %s925_s12  }
   0x3   : > { %p27_p1 = scmp.ge.s32.totalorder %s25_s15, 2  ;;  %p168_p2 = scmp.lt.s32.totalorder %s718_s14, 3 }
   0x5   : > { %s928_s15 = smov (%p27_p1, %s25_s15), 0  ;;  %p169_p3 = pnand %p615_p0, %p168_p2 }
   0x6   : > { %p206_p4 = scmp.lt.s32.totalorder (!%p169_p3), %s710_s12, 1 }
   0x7   : > { %172 = sbr.rel (%p169_p3) target bundleno = 215 (0xd7), region = 32 }
   0xc   : > { %s930_s12 = smov (!%p206_p4, %s710_s12), 1  ;;  %vm270_vm0 = vcmask 261120   ;;  %v839_v36 = vld [vmem:[%s923_s2] ss:$0 sm:$0xff] }
   0xd   : > { %s657_s16 = sshll.u32 %s930_s12, 5  ;;  %s656_s17 = sshll.u32 %s930_s12, 8 }
   0xe   : > { %s219_s20 = scalar_lea.vmem %s922_s1, %s657_s16  ;;  %s770_s23 = scalar_lea.vmem %s921_s0, %s656_s17 }
   0xf   : > { %v265_v0 = vld [vmem:[%s219_s20 + $0x18] sm:$0xff]  ;;  %v264_v1 = vld [vmem:[%s219_s20 + $0x10] sm:$0xff]  ;;  %v263_v2 = vld [vmem:[%s219_s20 + $0x8] sm:$0xff]  ;;  %s846_s28 = scalar_lea.vmem %s924_s3, %s656_s17 }
  0x10   : > { %660 = vmatpush.msra.mxu2 %v265_v0  ;;  %661 = vmatpush.msra.mxu3 %v265_v0  ;;  %v262_v3 = vld [vmem:[%s219_s20] sm:$0xff]  ;;  %v247_v8 = vld [vmem:[%s770_s23 + $0x88] sm:$0xff]  ;;  %v248_v12 = vld [vmem:[%s770_s23 + $0x90] sm:$0xff] }
  0x11   : > { %379 = vmatpush.msra.mxu0 %v265_v0  ;;  %659 = vmatpush.msra.mxu1 %v265_v0  ;;  %v246_v4 = vld [vmem:[%s770_s23 + $0x80] sm:$0xff]  ;;  %v255_v9 = vld [vmem:[%s770_s23 + $0xc8] sm:$0xff]  ;;  %v256_v13 = vld [vmem:[%s770_s23 + $0xd0] sm:$0xff] }
  0x12   : > { %663 = vmatpush.msra.mxu2 %v264_v1  ;;  %664 = vmatpush.msra.mxu3 %v264_v1  ;;  %v254_v5 = vld [vmem:[%s770_s23 + $0xc0] sm:$0xff]  ;;  %v231_v10 = vld [vmem:[%s770_s23 + $0x8] sm:$0xff]  ;;  %v232_v14 = vld [vmem:[%s770_s23 + $0x10] sm:$0xff] }
  0x13   : > { %380 = vmatpush.msra.mxu0 %v264_v1  ;;  %662 = vmatpush.msra.mxu1 %v264_v1  ;;  %v230_v6 = vld [vmem:[%s770_s23] sm:$0xff]  ;;  %v239_v11 = vld [vmem:[%s770_s23 + $0x48] sm:$0xff]  ;;  %v240_v15 = vld [vmem:[%s770_s23 + $0x50] sm:$0xff] }
  0x14   : > { %666 = vmatpush.msra.mxu2 %v263_v2  ;;  %667 = vmatpush.msra.mxu3 %v263_v2  ;;  %v238_v7 = vld [vmem:[%s770_s23 + $0x40] sm:$0xff]  ;;  %v249_v16 = vld [vmem:[%s770_s23 + $0x98] sm:$0xff]  ;;  %v251_v24 = vld [vmem:[%s770_s23 + $0xa8] sm:$0xff] }
  0x15   : > { %381 = vmatpush.msra.mxu0 %v263_v2  ;;  %665 = vmatpush.msra.mxu1 %v263_v2  ;;  %v257_v17 = vld [vmem:[%s770_s23 + $0xd8] sm:$0xff]  ;;  %v250_v20 = vld [vmem:[%s770_s23 + $0xa0] sm:$0xff]  ;;  %v259_v25 = vld [vmem:[%s770_s23 + $0xe8] sm:$0xff] }
  0x16   : > { %669 = vmatpush.msra.mxu2 %v262_v3  ;;  %670 = vmatpush.msra.mxu3 %v262_v3  ;;  %v233_v18 = vld [vmem:[%s770_s23 + $0x18] sm:$0xff]  ;;  %v258_v21 = vld [vmem:[%s770_s23 + $0xe0] sm:$0xff]  ;;  %v235_v26 = vld [vmem:[%s770_s23 + $0x28] sm:$0xff] }
  0x17   : > { %638 = vmatmul.msk.f32.vlgmr.msra.gmra.mxu2 %vm270_vm0, %v246_v4  ;;  %646 = vmatmul.msk.f32.vlgmr.msra.gmra.mxu3 %vm270_vm0, %v254_v5  ;;  %v241_v19 = vld [vmem:[%s770_s23 + $0x58] sm:$0xff]  ;;  %v234_v22 = vld [vmem:[%s770_s23 + $0x20] sm:$0xff]  ;;  %v243_v27 = vld [vmem:[%s770_s23 + $0x68] sm:$0xff] }
  0x18   : > { %382 = vmatpush.msra.mxu0 %v262_v3  ;;  %668 = vmatpush.msra.mxu1 %v262_v3  ;;  %v242_v23 = vld [vmem:[%s770_s23 + $0x60] sm:$0xff]  ;;  %v252_v28 = vld [vmem:[%s770_s23 + $0xb0] sm:$0xff]  ;;  %v253_v32 = vld [vmem:[%s770_s23 + $0xb8] sm:$0xff] }
  0x19   : > { %622 = vmatmul.msk.f32.vlgmr.msra.gmra.mxu0 %vm270_vm0, %v230_v6  ;;  %630 = vmatmul.msk.f32.vlgmr.msra.gmra.mxu1 %vm270_vm0, %v238_v7  ;;  %v260_v29 = vld [vmem:[%s770_s23 + $0xf0] sm:$0xff]  ;;  %v261_v33 = vld [vmem:[%s770_s23 + $0xf8] sm:$0xff] }
  0x1a   : > { %v236_v30 = vld [vmem:[%s770_s23 + $0x30] sm:$0xff]  ;;  %v237_v34 = vld [vmem:[%s770_s23 + $0x38] sm:$0xff] }
  0x1b   : > { %v244_v31 = vld [vmem:[%s770_s23 + $0x70] sm:$0xff]  ;;  %v245_v35 = vld [vmem:[%s770_s23 + $0x78] sm:$0xff] }
  0x1f   : > { %639 = vmatmul.msk.f32.gmra.mxu2 %vm270_vm0, %v247_v8  ;;  %647 = vmatmul.msk.f32.gmra.mxu3 %vm270_vm0, %v255_v9 }
  0x21   : > { %623 = vmatmul.msk.f32.gmra.mxu0 %vm270_vm0, %v231_v10  ;;  %631 = vmatmul.msk.f32.gmra.mxu1 %vm270_vm0, %v239_v11 }
  0x27   : > { %640 = vmatmul.msk.f32.gmra.mxu2 %vm270_vm0, %v248_v12  ;;  %648 = vmatmul.msk.f32.gmra.mxu3 %vm270_vm0, %v256_v13 }
  0x29   : > { %624 = vmatmul.msk.f32.gmra.mxu0 %vm270_vm0, %v232_v14  ;;  %632 = vmatmul.msk.f32.gmra.mxu1 %vm270_vm0, %v240_v15 }
  0x2f   : > { %641 = vmatmul.msk.f32.gmra.mxu2 %vm270_vm0, %v249_v16  ;;  %649 = vmatmul.msk.f32.gmra.mxu3 %vm270_vm0, %v257_v17 }
  0x31   : > { %625 = vmatmul.msk.f32.gmra.mxu0 %vm270_vm0, %v233_v18  ;;  %633 = vmatmul.msk.f32.gmra.mxu1 %vm270_vm0, %v241_v19 }
  0x37   : > { %642 = vmatmul.msk.f32.gmra.mxu2 %vm270_vm0, %v250_v20  ;;  %650 = vmatmul.msk.f32.gmra.mxu3 %vm270_vm0, %v258_v21 }
  0x39   : > { %626 = vmatmul.msk.f32.gmra.mxu0 %vm270_vm0, %v234_v22  ;;  %634 = vmatmul.msk.f32.gmra.mxu1 %vm270_vm0, %v242_v23 }
  0x3f   : > { %643 = vmatmul.msk.f32.gmra.mxu2 %vm270_vm0, %v251_v24  ;;  %651 = vmatmul.msk.f32.gmra.mxu3 %vm270_vm0, %v259_v25 }
  0x41   : > { %627 = vmatmul.msk.f32.gmra.mxu0 %vm270_vm0, %v235_v26  ;;  %635 = vmatmul.msk.f32.gmra.mxu1 %vm270_vm0, %v243_v27 }
  0x47   : > { %644 = vmatmul.msk.f32.gmra.mxu2 %vm270_vm0, %v252_v28  ;;  %652 = vmatmul.msk.f32.gmra.mxu3 %vm270_vm0, %v260_v29 }
  0x49   : > { %628 = vmatmul.msk.f32.gmra.mxu0 %vm270_vm0, %v236_v30  ;;  %636 = vmatmul.msk.f32.gmra.mxu1 %vm270_vm0, %v244_v31 }
  0x4f   : > { %645 = vmatmul.msk.f32.gmra.mxu2 %vm270_vm0, %v253_v32  ;;  %653 = vmatmul.msk.f32.gmra.mxu3 %vm270_vm0, %v261_v33 }
  0x51   : > { %629 = vmatmul.msk.f32.gmra.mxu0 %vm270_vm0, %v237_v34  ;;  %637 = vmatmul.msk.f32.gmra.mxu1 %vm270_vm0, %v245_v35 }
  0x96   : > { %v384_v37 = vpop.f32.mrf.mxu0  ;;  %v408_v38 = vpop.f32.mrf.mxu1 }
  0x97   : > { %v385_v39 = vadd.f32 %v839_v36, %v384_v37  ;;  %v409_v40 = vadd.f32 %v839_v36, %v408_v38 }
  0x99   : > { %480 = vst [vmem:[%s846_s28] sm:$0xff] %v385_v39 }
  0x9a   : > { %488 = vst [vmem:[%s846_s28 + $0x40] sm:$0xff] %v409_v40  ;;  %v432_v41 = vpop.f32.mrf.mxu2  ;;  %v456_v42 = vpop.f32.mrf.mxu3 }
  0x9b   : > { %v433_v43 = vadd.f32 %v839_v36, %v432_v41  ;;  %v457_v44 = vadd.f32 %v839_v36, %v456_v42 }
  0x9d   : > { %496 = vst [vmem:[%s846_s28 + $0x80] sm:$0xff] %v433_v43 }
  0x9e   : > { %504 = vst [vmem:[%s846_s28 + $0xc0] sm:$0xff] %v457_v44  ;;  %v387_v45 = vpop.f32.mrf.mxu0  ;;  %v411_v46 = vpop.f32.mrf.mxu1 }
  0x9f   : > { %v388_v47 = vadd.f32 %v839_v36, %v387_v45  ;;  %v412_v48 = vadd.f32 %v839_v36, %v411_v46 }
  0xa1   : > { %481 = vst [vmem:[%s846_s28 + $0x8] sm:$0xff] %v388_v47 }
  0xa2   : > { %489 = vst [vmem:[%s846_s28 + $0x48] sm:$0xff] %v412_v48  ;;  %v435_v49 = vpop.f32.mrf.mxu2  ;;  %v459_v50 = vpop.f32.mrf.mxu3 }
  0xa3   : > { %v436_v51 = vadd.f32 %v839_v36, %v435_v49  ;;  %v460_v52 = vadd.f32 %v839_v36, %v459_v50 }
  0xa5   : > { %497 = vst [vmem:[%s846_s28 + $0x88] sm:$0xff] %v436_v51 }
  0xa6   : > { %505 = vst [vmem:[%s846_s28 + $0xc8] sm:$0xff] %v460_v52  ;;  %v390_v53 = vpop.f32.mrf.mxu0  ;;  %v414_v54 = vpop.f32.mrf.mxu1 }
  0xa7   : > { %v391_v55 = vadd.f32 %v839_v36, %v390_v53  ;;  %v415_v56 = vadd.f32 %v839_v36, %v414_v54 }
  0xa9   : > { %482 = vst [vmem:[%s846_s28 + $0x10] sm:$0xff] %v391_v55 }
  0xaa   : > { %490 = vst [vmem:[%s846_s28 + $0x50] sm:$0xff] %v415_v56  ;;  %v438_v57 = vpop.f32.mrf.mxu2  ;;  %v462_v58 = vpop.f32.mrf.mxu3 }
  0xab   : > { %v439_v59 = vadd.f32 %v839_v36, %v438_v57  ;;  %v463_v60 = vadd.f32 %v839_v36, %v462_v58 }
  0xad   : > { %498 = vst [vmem:[%s846_s28 + $0x90] sm:$0xff] %v439_v59 }
  0xae   : > { %506 = vst [vmem:[%s846_s28 + $0xd0] sm:$0xff] %v463_v60  ;;  %v393_v61 = vpop.f32.mrf.mxu0  ;;  %v417_v62 = vpop.f32.mrf.mxu1 }
  0xaf   : > { %v394_v63 = vadd.f32 %v839_v36, %v393_v61  ;;  %v418_v0 = vadd.f32 %v839_v36, %v417_v62 }
  0xb1   : > { %483 = vst [vmem:[%s846_s28 + $0x18] sm:$0xff] %v394_v63 }
  0xb2   : > { %491 = vst [vmem:[%s846_s28 + $0x58] sm:$0xff] %v418_v0  ;;  %v441_v1 = vpop.f32.mrf.mxu2  ;;  %v465_v2 = vpop.f32.mrf.mxu3 }
  0xb3   : > { %v442_v3 = vadd.f32 %v839_v36, %v441_v1  ;;  %v466_v4 = vadd.f32 %v839_v36, %v465_v2 }
  0xb5   : > { %499 = vst [vmem:[%s846_s28 + $0x98] sm:$0xff] %v442_v3 }
  0xb6   : > { %507 = vst [vmem:[%s846_s28 + $0xd8] sm:$0xff] %v466_v4  ;;  %v396_v5 = vpop.f32.mrf.mxu0  ;;  %v420_v6 = vpop.f32.mrf.mxu1 }
  0xb7   : > { %v397_v7 = vadd.f32 %v839_v36, %v396_v5  ;;  %v421_v8 = vadd.f32 %v839_v36, %v420_v6 }
  0xb9   : > { %484 = vst [vmem:[%s846_s28 + $0x20] sm:$0xff] %v397_v7 }
  0xba   : > { %492 = vst [vmem:[%s846_s28 + $0x60] sm:$0xff] %v421_v8  ;;  %v444_v9 = vpop.f32.mrf.mxu2  ;;  %v468_v10 = vpop.f32.mrf.mxu3 }
  0xbb   : > { %v445_v11 = vadd.f32 %v839_v36, %v444_v9  ;;  %v469_v12 = vadd.f32 %v839_v36, %v468_v10 }
  0xbd   : > { %500 = vst [vmem:[%s846_s28 + $0xa0] sm:$0xff] %v445_v11 }
  0xbe   : > { %508 = vst [vmem:[%s846_s28 + $0xe0] sm:$0xff] %v469_v12  ;;  %v399_v13 = vpop.f32.mrf.mxu0  ;;  %v423_v14 = vpop.f32.mrf.mxu1 }
  0xbf   : > { %v400_v15 = vadd.f32 %v839_v36, %v399_v13  ;;  %v424_v16 = vadd.f32 %v839_v36, %v423_v14 }
  0xc1   : > { %485 = vst [vmem:[%s846_s28 + $0x28] sm:$0xff] %v400_v15 }
  0xc2   : > { %493 = vst [vmem:[%s846_s28 + $0x68] sm:$0xff] %v424_v16  ;;  %v447_v17 = vpop.f32.mrf.mxu2  ;;  %v471_v18 = vpop.f32.mrf.mxu3 }
  0xc3   : > { %v448_v19 = vadd.f32 %v839_v36, %v447_v17  ;;  %v472_v20 = vadd.f32 %v839_v36, %v471_v18 }
  0xc5   : > { %501 = vst [vmem:[%s846_s28 + $0xa8] sm:$0xff] %v448_v19 }
  0xc6   : > { %509 = vst [vmem:[%s846_s28 + $0xe8] sm:$0xff] %v472_v20  ;;  %v402_v21 = vpop.f32.mrf.mxu0  ;;  %v426_v22 = vpop.f32.mrf.mxu1 }
  0xc7   : > { %v403_v23 = vadd.f32 %v839_v36, %v402_v21  ;;  %v427_v24 = vadd.f32 %v839_v36, %v426_v22 }
  0xc9   : > { %486 = vst [vmem:[%s846_s28 + $0x30] sm:$0xff] %v403_v23 }
  0xca   : > { %494 = vst [vmem:[%s846_s28 + $0x70] sm:$0xff] %v427_v24  ;;  %v450_v25 = vpop.f32.mrf.mxu2  ;;  %v474_v26 = vpop.f32.mrf.mxu3 }
  0xcb   : > { %v451_v27 = vadd.f32 %v839_v36, %v450_v25  ;;  %v475_v28 = vadd.f32 %v839_v36, %v474_v26 }
  0xcd   : > { %502 = vst [vmem:[%s846_s28 + $0xb0] sm:$0xff] %v451_v27 }
  0xce   : > { %510 = vst [vmem:[%s846_s28 + $0xf0] sm:$0xff] %v475_v28  ;;  %v405_v29 = vpop.f32.mrf.mxu0  ;;  %v429_v30 = vpop.f32.mrf.mxu1 }
  0xcf   : > { %v406_v31 = vadd.f32 %v839_v36, %v405_v29  ;;  %v430_v32 = vadd.f32 %v839_v36, %v429_v30 }
  0xd1   : > { %487 = vst [vmem:[%s846_s28 + $0x38] sm:$0xff] %v406_v31 }
  0xd2   : > { %495 = vst [vmem:[%s846_s28 + $0x78] sm:$0xff] %v430_v32  ;;  %v453_v33 = vpop.f32.mrf.mxu2  ;;  %v477_v34 = vpop.f32.mrf.mxu3 }
  0xd3   : > { %v454_v35 = vadd.f32 %v839_v36, %v453_v33  ;;  %v478_v37 = vadd.f32 %v839_v36, %v477_v34 }
  0xd5   : > { %503 = vst [vmem:[%s846_s28 + $0xb8] sm:$0xff] %v454_v35 }
  0xd6   : > { %511 = vst [vmem:[%s846_s28 + $0xf8] sm:$0xff] %v478_v37 }
  0xd7 PF: > { %s13_s14 = sadd.s32 1, %s718_s14   ;;  %s925_s12 = smov %s714_s13 }
  0xd8   : > { %p10_p5 = scmp.ge.s32.totalorder %s13_s14, 4   ;;  %s926_s13 = smov %s928_s15 }
  0xda   :  { %12 = sbr.rel (!%p10_p5) target bundleno = 2 (0x2), region = 65 }

</bundles_post_ra>
